<compile_context>
chip_gen: v6e
topology: v6e:2x2x1
jax: 0.10.0
libtpu: 0.0.40
codegen_flags: <defaults>
</compile_context>

<pallas_src>
import jax
import jax.numpy as jnp
import numpy as np
from jax.experimental import pallas as pl
from jax.experimental.pallas import tpu as pltpu


# Weights smaller than this go through fused XLA (launch/step overhead dominates).
_MIN_PALLAS_WEIGHT_BYTES = 2 << 20
# Per-buffer weight-tile budget (bytes).
_WEIGHT_TILE_BUDGET = 8 << 20


def _pooler_linear_kernel(pooled_ref, w_ref, b_ref, o_ref):
    """One output-column tile of  o = pooled @ w.T + b.

    pooled: (B_pad, H_in)  resident in VMEM across the whole grid
    w:      (tn, H_in)     PyTorch [out, in] layout, contracted on dim 1 (trans_b)
    b:      (1, tn)
    o:      (B_pad, tn)
    """
    acc = jax.lax.dot_general(
        pooled_ref[...],
        w_ref[...],
        dimension_numbers=(((1,), (1,)), ((), ())),
        preferred_element_type=jnp.float32,
    )
    o_ref[...] = (acc + b_ref[...].astype(jnp.float32)).astype(o_ref.dtype)


def _generation_params():
    """(weight-tile budget bytes, scoped-VMEM limit bytes) for the attached TPU."""
    try:
        info = pltpu.get_tpu_info()
        vmem_cap = int(getattr(info, "vmem_capacity_bytes", 64 << 20))
    except Exception:  # not on TPU / API unavailable: conservative default
        vmem_cap = 64 << 20
    # v5e/v6e: 128 MiB physical VMEM -> 48 MiB limit; v7x: 64 MiB per TC -> 40 MiB.
    vmem_limit = min(48 << 20, (vmem_cap * 5) // 8)
    return _WEIGHT_TILE_BUDGET, vmem_limit


def _pick_col_tile(h_out, h_in, itemsize, budget_bytes):
    """Largest multiple-of-128 divisor tn of h_out s.t. the (tn, h_in) weight tile
    fits the budget and the grid (h_out // tn) is >= 2, preferring an even grid so
    the 'parallel' axis splits evenly across two TensorCores. None -> no valid tile."""
    fits = [t for t in range(128, h_out // 2 + 1, 128)
            if h_out % t == 0 and t * h_in * itemsize <= budget_bytes]
    if not fits:
        return None
    even = [t for t in fits if (h_out // t) % 2 == 0]
    return max(even) if even else max(fits)


def node_cls_pooler(x, batch, weight, bias, num_graphs):
    """JAX/Pallas equivalent of NodeClsPooler.forward.

    x:          [N, H_in] node features.
    batch:      [N] int graph assignment; must be sorted (same requirement as
                torch_geometric.utils.to_dense_batch).
    weight:     [H_out, H_in] nn.Linear weight in PyTorch layout.  Pass it already
                cast to bf16 to halve the HBM weight stream (f32 accumulation).
    bias:       [H_out].
    num_graphs: static Python int B.
    """
    N, H_in = x.shape
    H_out = weight.shape[0]
    B = int(num_graphs)

    # ---- to_dense_batch(x, batch)[0][:, 0]: first node of each graph ---------
    graph_ids = jnp.arange(B, dtype=batch.dtype)
    first_idx = jnp.searchsorted(batch, graph_ids, side="left")            # [B]
    safe_idx = jnp.minimum(first_idx, N - 1)
    valid = (first_idx < N) & (batch[safe_idx] == graph_ids)               # empty graph -> zero row
    pooled = jnp.where(valid[:, None], jnp.take(x, safe_idx, axis=0), 0)   # [B, H_in]
    pooled = pooled.astype(weight.dtype)
    bias2 = bias.reshape(1, H_out)

    w_itemsize = jnp.dtype(weight.dtype).itemsize
    weight_bytes = H_out * H_in * w_itemsize
    budget, vmem_limit = _generation_params()

    tn = None
    if (H_in % 128 == 0 and H_out % 128 == 0
            and weight_bytes >= _MIN_PALLAS_WEIGHT_BYTES):
        tn = _pick_col_tile(H_out, H_in, w_itemsize, budget)

    # ---- small / non-128-aligned / grid-of-1 shapes: fused XLA wins ----------
    if tn is None:
        out = jax.lax.dot_general(
            pooled, weight,
            dimension_numbers=(((1,), (1,)), ((), ())),
            preferred_element_type=jnp.float32,
        ) + bias2.astype(jnp.float32)
        return out.astype(x.dtype)

    # ---- Pallas: stream the weight in output-column tiles --------------------
    B_pad = ((B + 7) // 8) * 8        # full-sublane pooled / output blocks
    if B_pad != B:
        pooled = jnp.pad(pooled, ((0, B_pad - B), (0, 0)))

    num_tiles = H_out // tn
    if num_tiles >= 3:
        # Keep two weight DMAs in flight (DMA-limited pipeline). Fall back to the
        # default double-buffer if this jax build lacks the pipeline_mode kwarg.
        try:
            w_spec = pl.BlockSpec((tn, H_in), lambda j: (j, 0),
                                  pipeline_mode=pl.Buffered(3))
        except TypeError:
            w_spec = pl.BlockSpec((tn, H_in), lambda j: (j, 0))
    else:
        w_spec = pl.BlockSpec((tn, H_in), lambda j: (j, 0))

    out_dtype = x.dtype
    cost = pl.CostEstimate(
        flops=2 * B_pad * H_in * H_out,
        transcendentals=0,
        bytes_accessed=(weight_bytes
                        + B_pad * H_in * jnp.dtype(pooled.dtype).itemsize
                        + B_pad * H_out * jnp.dtype(out_dtype).itemsize
                        + H_out * jnp.dtype(bias.dtype).itemsize),
    )

    out = pl.pallas_call(
        _pooler_linear_kernel,
        out_shape=jax.ShapeDtypeStruct((B_pad, H_out), out_dtype),
        grid=(num_tiles,),
        in_specs=[
            pl.BlockSpec((B_pad, H_in), lambda j: (0, 0)),   # pooled: resident
            w_spec,                                          # weight column tile
            pl.BlockSpec((1, tn), lambda j: (0, j)),         # bias tile
        ],
        out_specs=pl.BlockSpec((B_pad, tn), lambda j: (0, j)),
        compiler_params=pltpu.CompilerParams(
            dimension_semantics=("parallel",),               # shard tiles across TCs
            vmem_limit_bytes=vmem_limit,
        ),
        cost_estimate=cost,
    )(pooled, weight, bias2)

    return out[:B] if B_pad != B else out


if __name__ == "__main__":
    key = jax.random.PRNGKey(0)
    keys = jax.random.split(key, 8)

    # B=7 (not a multiple of 8) exercises the sublane-padding path.
    B = 7
    counts = np.array([10, 6, 8, 9, 7, 12, 8])
    N = int(counts.sum())                                   # 60 nodes
    batch = jnp.asarray(np.repeat(np.arange(B), counts), dtype=jnp.int32)  # sorted
    first = np.concatenate([[0], np.cumsum(counts)[:-1]]).astype(np.int32)

    def ref_out(x, w, b):
        xp = np.asarray(x, np.float64)[first]
        return xp @ np.asarray(w, np.float64).T + np.asarray(b, np.float64)

    # --- 1) module default hidden_channels=128: tiny weight -> fused-XLA path ---
    H = 128
    x1 = jax.random.normal(keys[0], (N, H), dtype=jnp.float32)
    w1 = jax.random.normal(keys[1], (H, H), dtype=jnp.float32) * 0.1
    b1 = jax.random.normal(keys[2], (H,), dtype=jnp.float32) * 0.1
    out1 = jax.block_until_ready(node_cls_pooler(x1, batch, w1, b1, num_graphs=B))
    assert out1.shape == (B, H)
    np.testing.assert_allclose(np.asarray(out1), ref_out(x1, w1, b1),
                               rtol=2e-2, atol=2e-2)

    # --- 2) Pallas path: f32 weight (4 MiB), grid of 2 even column tiles --------
    Hin, Hout = 1024, 1024
    x2 = jax.random.normal(keys[3], (N, Hin), dtype=jnp.float32)
    w2 = jax.random.normal(keys[4], (Hout, Hin), dtype=jnp.float32) * 0.05
    b2 = jax.random.normal(keys[5], (Hout,), dtype=jnp.float32) * 0.1
    out2 = jax.block_until_ready(node_cls_pooler(x2, batch, w2, b2, num_graphs=B))
    assert out2.shape == (B, Hout)
    np.testing.assert_allclose(np.asarray(out2), ref_out(x2, w2, b2),
                               rtol=2e-2, atol=2e-2)

    # bf16 weight stream (halved HBM traffic, f32 accumulation)
    out2b = jax.block_until_ready(
        node_cls_pooler(x2, batch, w2.astype(jnp.bfloat16), b2, num_graphs=B))
    np.testing.assert_allclose(np.asarray(out2b), ref_out(x2, w2, b2),
                               rtol=5e-2, atol=1e-1)

    # --- 3) Pallas path with >= 3 column tiles (exercises Buffered(3) weights) --
    Hin3, Hout3 = 4096, 2048
    x3 = jax.random.normal(keys[6], (N, Hin3), dtype=jnp.float32)
    w3 = jax.random.normal(keys[7], (Hout3, Hin3), dtype=jnp.float32) * 0.02
    b3 = jnp.zeros((Hout3,), dtype=jnp.float32)
    out3 = jax.block_until_ready(node_cls_pooler(x3, batch, w3, b3, num_graphs=B))
    assert out3.shape == (B, Hout3)
    np.testing.assert_allclose(np.asarray(out3), ref_out(x3, w3, b3),
                               rtol=2e-2, atol=2e-2)

    print("KERNEL_OK")
</pallas_src>

<mosaic_0001>
module attributes {stable_mosaic.version = 11 : i64} {
  func.func @_pooler_linear_kernel(%arg0: i32, %arg1: memref<8x1024xf32, #tpu.memory_space<vmem>>, %arg2: memref<512x1024xf32, #tpu.memory_space<vmem>>, %arg3: memref<1x512xf32, #tpu.memory_space<vmem>>, %arg4: memref<8x512xf32, #tpu.memory_space<vmem>>) attributes {dimension_semantics = [#tpu.dimension_semantics<parallel>], iteration_bounds = array<i64: 2>, scalar_prefetch = 0 : i64, scratch_operands = 0 : i64, tpu.core_type = #tpu.core_type<tc>, window_params = [{pipeline_mode = #tpu.pipeline_mode<synchronous>, transform_indices = @transform_0, window_bounds = array<i64: 8, 1024>}, {transform_indices = @transform_1, window_bounds = array<i64: 512, 1024>}, {transform_indices = @transform_2, window_bounds = array<i64: 1, 512>}, {transform_indices = @transform_3, window_bounds = array<i64: 8, 512>}]} {
    %c0 = arith.constant 0 : index
    %c0_0 = arith.constant 0 : index
    %0 = vector.load %arg1[%c0, %c0_0] : memref<8x1024xf32, #tpu.memory_space<vmem>>, vector<8x1024xf32>
    %c0_1 = arith.constant 0 : index
    %c0_2 = arith.constant 0 : index
    %1 = vector.load %arg2[%c0_1, %c0_2] : memref<512x1024xf32, #tpu.memory_space<vmem>>, vector<512x1024xf32>
    %cst = arith.constant dense<0.000000e+00> : vector<8x512xf32>
    %2 = tpu.matmul %0, %1, %cst {dimension_numbers = #tpu.dot_dimension_numbers<[1], [1], [0], [0], [0, 0, 1, 0], [], []>} : vector<8x1024xf32>, vector<512x1024xf32>, vector<8x512xf32> -> vector<8x512xf32>
    %c0_3 = arith.constant 0 : index
    %c0_4 = arith.constant 0 : index
    %3 = vector.load %arg3[%c0_3, %c0_4] : memref<1x512xf32, #tpu.memory_space<vmem>>, vector<1x512xf32>
    %4 = vector.broadcast %3 : vector<1x512xf32> to vector<8x512xf32>
    %5 = arith.addf %2, %4 : vector<8x512xf32>
    %c0_5 = arith.constant 0 : index
    %c0_6 = arith.constant 0 : index
    %6 = vector.load %arg4[%c0_5, %c0_6] : memref<8x512xf32, #tpu.memory_space<vmem>>, vector<8x512xf32>
    tpu.vector_store %arg4[%c0_5, %c0_6], %5 {strides = array<i32>} : memref<8x512xf32, #tpu.memory_space<vmem>>, vector<8x512xf32>,
    return
  }
  func.func @transform_0(%arg0: i32) -> (i32, i32) {
    %c0_i32 = arith.constant 0 : i32
    %c0_i32_0 = arith.constant 0 : i32
    %c0_i32_1 = arith.constant 0 : i32
    return %c0_i32, %c0_i32_0 : i32, i32
  }
  func.func @transform_1(%arg0: i32) -> (i32, i32) {
    %c0_i32 = arith.constant 0 : i32
    %c0_i32_0 = arith.constant 0 : i32
    return %arg0, %c0_i32 : i32, i32
  }
  func.func @transform_2(%arg0: i32) -> (i32, i32) {
    %c0_i32 = arith.constant 0 : i32
    %c0_i32_0 = arith.constant 0 : i32
    return %c0_i32, %arg0 : i32, i32
  }
  func.func @transform_3(%arg0: i32) -> (i32, i32) {
    %c0_i32 = arith.constant 0 : i32
    %c0_i32_0 = arith.constant 0 : i32
    return %c0_i32, %arg0 : i32, i32
  }
}

</mosaic_0001>

<bundles_post_ra>
// kernel: tpu_custom_call.1
= control target key start
LH: loop header
LB: loop body
LE: loop exit
PB: predicated region body
PF: predicated region fallthrough
CT: control target
= control target key end

     0   :  { %8 = vsyncpa [#allocation3], 0  ;;  %s2498_s0 = inlined_call_operand.hbm [shape: f32[8,1024], index: 0, kind: input, shape index: {}]   ;;  %s2499_s1 = inlined_call_operand.hbm [shape: f32[1024,1024], index: 1, kind: input, shape index: {}]   ;;  %s2500_s2 = inlined_call_operand.hbm [shape: f32[1,1024], index: 2, kind: input, shape index: {}]   ;;  %s2501_s3 = inlined_call_operand.hbm [shape: f32[8,1024], index: 3, kind: output, shape index: {}]  }
   0x1   :  { %9 = vsyncpa [#allocation6], 0 }
   0x2   :  { %11 = vsyncpa [#allocation6 + $0x1], 0 }
   0x3   :  { %12 = vsyncpa [#allocation4], 0 }
   0x4   :  { %14 = vsyncpa [#allocation4 + $0x1], 0  ;;  %s1745_s12 = smov 0   ;;  %s1747_s13 = smov 0  }
   0x5   :  { %s1749_s14 = smov 0   ;;  %s1751_s15 = smov 0  }
   0x6 LB: > { %s1766_s16 = sadd.s32 1, %s1717_s15   ;;  %s48_s17 = sadd.s32 1, %s1713_s14  ;;  %s1717_s15 = sphi %s1751_s15, %s2524_s15   ;;  %s1713_s14 = sphi %s1749_s14, %s2523_s14   ;;  %s1709_s13 = sphi %s1747_s13, %s2522_s13   ;;  %s1705_s12 = sphi %s1745_s12, %s2521_s12  }
   0x7   : > { %s45_s18 = ssub.s32 %s1717_s15, %s1766_s16  ;;  %p55_p0 = scmp.ne.s32.totalorder %s1713_s14, %s1709_s13 }
   0x8   : > { %p46_p1 = scmp.eq.s32.totalorder %s45_s18, 0  ;;  %p56_p2 = scmp.eq.s32.totalorder %s1717_s15, 0 }
   0x9   : > { %p1523_p4 = scmp.lt.s32.totalorder %s1717_s15, 2  ;;  %s148_s20 = sand.u32 1, %s1717_s15  }
   0xa   : > { %s1777_s19 = scalar_select %p46_p1, %s1713_s14, %s48_s17  }
   0xb   : > { %p57_p5 = por %p56_p2, %p55_p0  ;;  %s150_s21 = sand.u32 1, %s1713_s14  }
   0xc   : > { %s1476_s22 = sshll.u32 %s150_s21, 12  ;;  %s1494_s23 = sshll.u32 %s1717_s15, 16 }
   0xd   : > { %s1790_s26 = scalar_lea.hbm %s2499_s1, %s1494_s23  ;;  %s152_s27 = scalar_lea.vmem [#allocation5], %s1476_s22 }
   0xe   : > { %s160_s28 = sshll.u32 %s152_s27, 4  ;;  %p1792_p6 = pnand %p1523_p4, %p57_p5  ;;  %s1796_s28 = int_to_ptr.vmem [resolvable:$true] %s160_s28 }
   0xf   : > { %s1798_s30 = scalar_lea.sflag [#allocation6], %s148_s20  ;;  %s1567_s4 = scalar_lea.hbm %s1790_s26, 65536 }
  0x10   : > { %p1568_p7 = scmp.ne.s32.totalorder %s1790_s26, %s1567_s4  ;;  %p1569_p8 = pneg %p1792_p6 }
  0x11   : > { %s1572_s7 = scalar_lea.hbm %s2499_s1, 131072  ;;  %p1573_p11 = scmp.lt.s32.totalorder %s1790_s26, %s2499_s1 }
  0x12   : > { %p1570_p9 = pnand %p1569_p8, %p1568_p7  ;;  %p1574_p12 = scmp.lt.s32.totalorder %s1572_s7, %s1567_s4 }
  0x14   : > { %p1571_p10 = pneg %p1570_p9  ;;  %p1575_p13 = por %p1574_p12, %p1573_p11 }
  0x16   : > { %p1576_p1 = pnand %p1575_p13, %p1571_p10 }
  0x18   : > { %1579 = shalt.err (!%p1576_p1)
}
  0x19   : > { %s1580_s10 = scalar_lea.vmem %s1796_s28, 65536  ;;  %s1719_s11 = smov [#allocation5]  }
  0x1a   : > { %p1581_p2 = scmp.ne.s32.totalorder %s1796_s28, %s1580_s10  ;;  %s1585_s17 = sshll.u32 %s1719_s11, 4  ;;  %s1586_s17 = int_to_ptr.vmem [resolvable:$false] %s1585_s17 }
  0x1b   : > { %s1587_s18 = scalar_lea.vmem %s1586_s17, 131072  ;;  %p1588_p7 = scmp.lt.s32.totalorder %s1796_s28, %s1586_s17 }
  0x1c   : > { %p1583_p4 = pnand %p1581_p2, %p1569_p8  ;;  %p1589_p9 = scmp.lt.s32.totalorder %s1587_s18, %s1580_s10 }
  0x1e   : > { %p1584_p5 = pneg %p1583_p4  ;;  %p1590_p3 = por %p1589_p9, %p1588_p7 }
  0x20   : > { %p1591_p11 = pnand %p1590_p3, %p1584_p5 }
  0x22   : > { %1594 = shalt.err (!%p1591_p11)
}
  0x23   : > { %s1720_s20 = smov 1024   ;;  %s1721_s22 = smov 64  }
  0x24   : > { %1514 = dma.hbm_to_vmem [thread:$0]  (!%p1792_p6), %s1790_s26, 65536, %s1796_s28, %s1798_s30, %s1720_s20, %s1720_s20, %s1721_s22  }
  0x25   : > { %s1826_s23 = sadd.s32 4294967295, %s1717_s15   ;;  %s1472_s24 = sadd.s32 4294967294, %s1717_s15  }
  0x26   : > { %p61_p3 = scmp.ne.s32.totalorder %s1709_s13, %s1705_s12  ;;  %p2502_p10 = scmp.eq.s32.totalorder %s1826_s23, 0 }
  0x27   : > { %p111_p12 = scmp.eq.s32.totalorder %s1826_s23, 1  ;;  %p117_p13 = scmp.eq.s32.totalorder %s1472_s24, 1 }
  0x28   : > { %p1835_p1 = por %p2502_p10, %p61_p3  ;;  %p1473_p2 = scmp.ge.s32.totalorder %s1717_s15, 1 }
  0x29   : > { %p1843_p4 = por %p111_p12, %p55_p0  ;;  %p1847_p5 = por %p117_p13, %p61_p3 }
  0x2a   : > { %s2508_s25 = scalar_select %p1835_p1, 1, 0 }
  0x2b   : > { %s2509_s26 = scalar_select %p1843_p4, 1, 0 }
  0x2c   : > { %s2510_s27 = scalar_select %p1847_p5, 1, 0 }
  0x2d   : > { %p124_p7 = scmp.lt.s32.totalorder %s1717_s15, 3  ;;  %s1480_s28 = sshll.u32 %s150_s21, 2 }
  0x2e   : > { %s1722_s5 = smov [#allocation2]   ;;  %s1495_s7 = sshll.u32 %s1717_s15, 6 }
  0x2f   : > { %p1854_p9 = pnand %p1473_p2, %p124_p7  ;;  %s137_s6 = sshll.u32 %s1722_s5, 4  ;;  %s1858_s6 = int_to_ptr.vmem [resolvable:$true] %s137_s6 }
  0x30   : > { %s1866_s10 = scalar_lea.hbm %s2500_s2, %s1495_s7  ;;  %s174_s21 = scalar_lea.vmem [#allocation7], %s1480_s28 }
  0x31   : > { %s2511_s4 = scalar_select %p1854_p9, 1, 0 }
  0x32   : > { %p1507_p0 = pneg %p1854_p9  ;;  %s182_s11 = sshll.u32 %s174_s21, 4  ;;  %s183_s11 = int_to_ptr.vmem [resolvable:$true] %s182_s11 }
  0x33   : > { %s1595_s18 = scalar_lea.hbm %s1866_s10, 64  ;;  %s1600_s24 = scalar_lea.hbm %s2500_s2, 128 }
  0x34   : > { %p1870_p11 = pnand %p1507_p0, %p2502_p10  ;;  %p1596_p3 = scmp.ne.s32.totalorder %s1866_s10, %s1595_s18 }
  0x35   : > { %p1601_p2 = scmp.lt.s32.totalorder %s1866_s10, %s2500_s2  ;;  %p1602_p7 = scmp.lt.s32.totalorder %s1600_s24, %s1595_s18 }
  0x36   : > { %s2512_s17 = scalar_select %p1870_p11, 1, 0 }
  0x37   : > { %p1598_p12 = pnand %p1596_p3, %p1569_p8  ;;  %p1603_p0 = por %p1602_p7, %p1601_p2 }
  0x39   : > { %p1599_p13 = pneg %p1598_p12 }
  0x3b   : > { %p1604_p10 = pnand %p1603_p0, %p1599_p13 }
  0x3d   : > { %1607 = shalt.err (!%p1604_p10)
}
  0x3e   : > { %s1608_s28 = scalar_lea.vmem %s183_s11, 64  ;;  %s1723_s8 = smov [#allocation7]  }
  0x3f   : > { %p1609_p5 = scmp.ne.s32.totalorder %s183_s11, %s1608_s28  ;;  %s1613_s9 = sshll.u32 %s1723_s8, 4  ;;  %s1614_s9 = int_to_ptr.vmem [resolvable:$false] %s1613_s9 }
  0x40   : > { %s1615_s21 = scalar_lea.vmem %s1614_s9, 128  ;;  %p1616_p12 = scmp.lt.s32.totalorder %s183_s11, %s1614_s9 }
  0x41   : > { %p1611_p4 = pnand %p1609_p5, %p1569_p8  ;;  %p1617_p1 = scmp.lt.s32.totalorder %s1615_s21, %s1608_s28 }
  0x43   : > { %p1612_p3 = pneg %p1611_p4  ;;  %p1618_p9 = por %p1617_p1, %p1616_p12 }
  0x45   : > { %p1619_p11 = pnand %p1618_p9, %p1612_p3 }
  0x47   : > { %1622 = shalt.err (!%p1619_p11)
}
  0x48   : > { %1517 = dma.hbm_to_vmem [thread:$0]  (!%p1792_p6), %s1866_s10, 64, %s183_s11, %s1798_s30  }
  0x49   : > { %p2513_p8 = scmp.ne.s32.totalorder %s2512_s17, 0  ;;  %s1634_s18 = scalar_lea.vmem %s1858_s6, 1024 }
  0x4a   : > { %p1635_p4 = scmp.ne.s32.totalorder %s1858_s6, %s1634_s18  ;;  %p1642_p2 = scmp.lt.s32.totalorder %s1858_s6, %s1858_s6 }
  0x4b   : > { %p1625_p10 = pneg %p2513_p8  ;;  %p1643_p1 = scmp.lt.s32.totalorder %s1634_s18, %s1634_s18 }
  0x4d   : > { %p1637_p5 = pnand %p1635_p4, %p1625_p10  ;;  %p1644_p9 = por %p1643_p1, %p1642_p2 }
  0x4f   : > { %p1638_p13 = pneg %p1637_p5 }
  0x51   : > { %p1645_p11 = pnand %p1644_p9, %p1638_p13 }
  0x53   : > { %1648 = shalt.err (!%p1645_p11)
}
  0x54   : > { %1510 = dma.hbm_to_vmem [thread:$0]  (!%p2513_p8), %s2498_s0, 1024, %s1858_s6, [#allocation3]  }
  0x55   : > { %p2514_p6 = scmp.ne.s32.totalorder %s2511_s4, 0 }
  0x56   : > { %p2515_p7 = scmp.eq.s32.totalorder (!%p2514_p6), %s1826_s23, 0 }
  0x57   : > { %191 = sbr.rel (%p2514_p6) target bundleno = 823 (0x337), region = 32 }
  0x5c   : > { %1692 = dma.done.wait (%p2515_p7), [#allocation3], 1024   ;;  %p2516_p0 = pmov %p2515_p7 }
  0x5d   : > { %s197_s30 = sand.u32 1, %s1826_s23   ;;  %s1913_s10 = sand.u32 1, %s1709_s13  }
  0x5e   : > { %1694 = vsyncadd (%p2516_p0), [#allocation3], 4294966272  ;;  %s1485_s11 = sshll.u32 %s1913_s10, 12  ;;  %s198_s17 = scalar_lea.sflag [#allocation6], %s197_s30 }
  0x5f   : > { %s1916_s22 = scalar_lea.vmem [#allocation5], %s1485_s11  ;;  %p2517_p3 = scmp.ne.s32.totalorder %s2508_s25, 0 }
  0x61   : > { %1696 = dma.done.wait (%p2517_p3), %s198_s17, 65600  }
  0x62   : > { %1698 = vsyncadd (%p2517_p3), %s198_s17, 4294901696  ;;  %v370_v0 = vld [vmem:[%s1916_s22 + $0x3c8] sm:$0xff]  ;;  %v372_v1 = vld [vmem:[%s1916_s22 + $0x3d8] sm:$0xff]  ;;  %s1486_s25 = sshll.u32 %s1913_s10, 2  ;;  %s1487_s6 = sshll.u32 %s1913_s10, 5 }
  0x63   : > { %v369_v2 = vld [vmem:[%s1916_s22 + $0x3c0] sm:$0xff]  ;;  %783 = vmatprep.subr.mxu0 %v370_v0  ;;  %854 = vmatprep.subr.mxu1 %v372_v1  ;;  %v371_v3 = vld [vmem:[%s1916_s22 + $0x3d0] sm:$0xff]  ;;  %v362_v4 = vld [vmem:[%s1916_s22 + $0x388] sm:$0xff]  ;;  %s210_s4 = scalar_lea.vmem [#allocation7], %s1486_s25  ;;  %s2398_s24 = scalar_lea.vmem [#allocation8], %s1487_s6 }
  0x64   : > { %v364_v5 = vld [vmem:[%s1916_s22 + $0x398] sm:$0xff]  ;;  %784 = vmatpush1.xpose.msra.mxu0 %v369_v2  ;;  %855 = vmatpush1.xpose.msra.mxu1 %v371_v3  ;;  %v361_v6 = vld [vmem:[%s1916_s22 + $0x380] sm:$0xff]  ;;  %v363_v7 = vld [vmem:[%s1916_s22 + $0x390] sm:$0xff]  ;;  %s1496_s5 = sshll.u32 %s1826_s23, 9  ;;  %s1370_s7 = sshll.u32 %s2398_s24, 4  ;;  %s1371_s7 = int_to_ptr.vmem [resolvable:$true] %s1370_s7 }
  0x65   : > { %785 = vmatprep.subr.mxu0 %v362_v4  ;;  %856 = vmatprep.subr.mxu1 %v364_v5  ;;  %v354_v8 = vld [vmem:[%s1916_s22 + $0x348] sm:$0xff]  ;;  %v356_v9 = vld [vmem:[%s1916_s22 + $0x358] sm:$0xff]  ;;  %v353_v10 = vld [vmem:[%s1916_s22 + $0x340] sm:$0xff]  ;;  %s1368_s9 = scalar_lea.hbm %s2501_s3, %s1496_s5  ;;  %s1356_s21 = scalar_lea.sflag [#allocation4], %s1913_s10 }
  0x66   : > { %v355_v11 = vld [vmem:[%s1916_s22 + $0x350] sm:$0xff]  ;;  %v346_v12 = vld [vmem:[%s1916_s22 + $0x308] sm:$0xff]  ;;  %v348_v13 = vld [vmem:[%s1916_s22 + $0x318] sm:$0xff]  ;;  %s1649_s18 = scalar_lea.vmem %s1371_s7, 512  ;;  %p2518_p8 = scmp.ne.s32.totalorder %s2509_s26, 0 }
  0x67   : > { %v345_v14 = vld [vmem:[%s1916_s22 + $0x300] sm:$0xff]  ;;  %v347_v15 = vld [vmem:[%s1916_s22 + $0x310] sm:$0xff]  ;;  %v338_v16 = vld [vmem:[%s1916_s22 + $0x2c8] sm:$0xff]  ;;  %p1650_p12 = scmp.ne.s32.totalorder %s1371_s7, %s1649_s18  ;;  %s1724_s29 = smov [#allocation8]  }
  0x68   : > { %786 = vmatpush1.xpose.msra.mxu0 %v361_v6  ;;  %857 = vmatpush1.xpose.msra.mxu1 %v363_v7  ;;  %v340_v17 = vld [vmem:[%s1916_s22 + $0x2d8] sm:$0xff]  ;;  %v337_v18 = vld [vmem:[%s1916_s22 + $0x2c0] sm:$0xff]  ;;  %v339_v19 = vld [vmem:[%s1916_s22 + $0x2d0] sm:$0xff]  ;;  %s1653_s23 = sshll.u32 %s1724_s29, 4  ;;  %s1654_s23 = int_to_ptr.vmem [resolvable:$false] %s1653_s23 }
  0x69   : > { %787 = vmatprep.subr.mxu0 %v354_v8  ;;  %858 = vmatprep.subr.mxu1 %v356_v9  ;;  %v330_v20 = vld [vmem:[%s1916_s22 + $0x288] sm:$0xff]  ;;  %v332_v21 = vld [vmem:[%s1916_s22 + $0x298] sm:$0xff]  ;;  %v329_v22 = vld [vmem:[%s1916_s22 + $0x280] sm:$0xff]  ;;  %p1651_p10 = pnand %p1650_p12, %p2518_p8  ;;  %s1655_s20 = scalar_lea.vmem %s1654_s23, 1024 }
  0x6a   : > { %v331_v23 = vld [vmem:[%s1916_s22 + $0x290] sm:$0xff]  ;;  %v322_v24 = vld [vmem:[%s1916_s22 + $0x248] sm:$0xff]  ;;  %v324_v25 = vld [vmem:[%s1916_s22 + $0x258] sm:$0xff]  ;;  %p1656_p5 = scmp.lt.s32.totalorder %s1371_s7, %s1654_s23  ;;  %p1657_p13 = scmp.lt.s32.totalorder %s1655_s20, %s1649_s18 }
  0x6b   : > { %v321_v26 = vld [vmem:[%s1916_s22 + $0x240] sm:$0xff]  ;;  %v323_v27 = vld [vmem:[%s1916_s22 + $0x250] sm:$0xff]  ;;  %v314_v28 = vld [vmem:[%s1916_s22 + $0x208] sm:$0xff]  ;;  %p1652_p4 = pneg %p1651_p10 }
  0x6c   : > { %788 = vmatpush1.xpose.msra.mxu0 %v353_v10  ;;  %859 = vmatpush1.xpose.msra.mxu1 %v355_v11  ;;  %v316_v29 = vld [vmem:[%s1916_s22 + $0x218] sm:$0xff]  ;;  %v313_v30 = vld [vmem:[%s1916_s22 + $0x200] sm:$0xff]  ;;  %v315_v31 = vld [vmem:[%s1916_s22 + $0x210] sm:$0xff]  ;;  %p1658_p2 = por %p1657_p13, %p1656_p5 }
  0x6d   : > { %789 = vmatprep.subr.mxu0 %v346_v12  ;;  %860 = vmatprep.subr.mxu1 %v348_v13  ;;  %v306_v32 = vld [vmem:[%s1916_s22 + $0x1c8] sm:$0xff]  ;;  %v308_v33 = vld [vmem:[%s1916_s22 + $0x1d8] sm:$0xff]  ;;  %v305_v34 = vld [vmem:[%s1916_s22 + $0x1c0] sm:$0xff] }
  0x6e   : > { %v307_v35 = vld [vmem:[%s1916_s22 + $0x1d0] sm:$0xff]  ;;  %v298_v36 = vld [vmem:[%s1916_s22 + $0x188] sm:$0xff]  ;;  %v300_v37 = vld [vmem:[%s1916_s22 + $0x198] sm:$0xff]  ;;  %p1659_p1 = pnand %p1658_p2, %p1652_p4 }
  0x6f   : > { %v297_v38 = vld [vmem:[%s1916_s22 + $0x180] sm:$0xff]  ;;  %v299_v39 = vld [vmem:[%s1916_s22 + $0x190] sm:$0xff]  ;;  %v290_v40 = vld [vmem:[%s1916_s22 + $0x148] sm:$0xff] }
  0x70   : > { %790 = vmatpush1.xpose.msra.mxu0 %v345_v14  ;;  %861 = vmatpush1.xpose.msra.mxu1 %v347_v15  ;;  %v292_v41 = vld [vmem:[%s1916_s22 + $0x158] sm:$0xff]  ;;  %v289_v42 = vld [vmem:[%s1916_s22 + $0x140] sm:$0xff]  ;;  %v291_v43 = vld [vmem:[%s1916_s22 + $0x150] sm:$0xff] }
  0x71   : > { %791 = vmatprep.subr.mxu0 %v338_v16  ;;  %862 = vmatprep.subr.mxu1 %v340_v17  ;;  %v282_v44 = vld [vmem:[%s1916_s22 + $0x108] sm:$0xff]  ;;  %v284_v45 = vld [vmem:[%s1916_s22 + $0x118] sm:$0xff]  ;;  %v281_v47 = vld [vmem:[%s1916_s22 + $0x100] sm:$0xff] }
  0x72   : > { %v1968_v46 = vld [vmem:[#allocation2 + $0x8] sm:$0xff]  ;;  %v283_v48 = vld [vmem:[%s1916_s22 + $0x110] sm:$0xff]  ;;  %v1972_v49 = vld [vmem:[#allocation2 + $0x18] sm:$0xff] }
  0x73   : > { %v274_v50 = vld [vmem:[%s1916_s22 + $0xc8] sm:$0xff]  ;;  %v276_v51 = vld [vmem:[%s1916_s22 + $0xd8] sm:$0xff]  ;;  %847 = vmatprep.mubr.f32.mxu0 %v1968_v46  ;;  %918 = vmatprep.mubr.f32.mxu1 %v1972_v49  ;;  %v273_v52 = vld [vmem:[%s1916_s22 + $0xc0] sm:$0xff] }
  0x74   : > { %792 = vmatpush1.xpose.msra.mxu0 %v337_v18  ;;  %863 = vmatpush1.xpose.msra.mxu1 %v339_v19  ;;  %v275_v53 = vld [vmem:[%s1916_s22 + $0xd0] sm:$0xff]  ;;  %v266_v54 = vld [vmem:[%s1916_s22 + $0x88] sm:$0xff]  ;;  %v268_v55 = vld [vmem:[%s1916_s22 + $0x98] sm:$0xff] }
  0x75   : > { %793 = vmatprep.subr.mxu0 %v330_v20  ;;  %864 = vmatprep.subr.mxu1 %v332_v21  ;;  %v265_v56 = vld [vmem:[%s1916_s22 + $0x80] sm:$0xff]  ;;  %v267_v57 = vld [vmem:[%s1916_s22 + $0x90] sm:$0xff]  ;;  %v258_v58 = vld [vmem:[%s1916_s22 + $0x48] sm:$0xff] }
  0x76   : > { %v260_v59 = vld [vmem:[%s1916_s22 + $0x58] sm:$0xff]  ;;  %v257_v60 = vld [vmem:[%s1916_s22 + $0x40] sm:$0xff]  ;;  %v259_v61 = vld [vmem:[%s1916_s22 + $0x50] sm:$0xff] }
  0x77   : > { %v250_v62 = vld [vmem:[%s1916_s22 + $0x8] sm:$0xff]  ;;  %v252_v63 = vld [vmem:[%s1916_s22 + $0x18] sm:$0xff]  ;;  %v249_v0 = vld [vmem:[%s1916_s22] sm:$0xff] }
  0x78   : > { %794 = vmatpush1.xpose.msra.mxu0 %v329_v22  ;;  %865 = vmatpush1.xpose.msra.mxu1 %v331_v23  ;;  %v251_v1 = vld [vmem:[%s1916_s22 + $0x10] sm:$0xff]  ;;  %v498_v2 = vld [vmem:[%s1916_s22 + $0x7c8] sm:$0xff]  ;;  %v500_v3 = vld [vmem:[%s1916_s22 + $0x7d8] sm:$0xff] }
  0x79   : > { %795 = vmatprep.subr.mxu0 %v322_v24  ;;  %866 = vmatprep.subr.mxu1 %v324_v25  ;;  %v497_v4 = vld [vmem:[%s1916_s22 + $0x7c0] sm:$0xff]  ;;  %v499_v5 = vld [vmem:[%s1916_s22 + $0x7d0] sm:$0xff]  ;;  %v490_v6 = vld [vmem:[%s1916_s22 + $0x788] sm:$0xff] }
  0x7a   : > { %v492_v7 = vld [vmem:[%s1916_s22 + $0x798] sm:$0xff]  ;;  %v489_v8 = vld [vmem:[%s1916_s22 + $0x780] sm:$0xff]  ;;  %v491_v9 = vld [vmem:[%s1916_s22 + $0x790] sm:$0xff] }
  0x7b   : > { %v482_v10 = vld [vmem:[%s1916_s22 + $0x748] sm:$0xff]  ;;  %v484_v11 = vld [vmem:[%s1916_s22 + $0x758] sm:$0xff]  ;;  %v481_v12 = vld [vmem:[%s1916_s22 + $0x740] sm:$0xff] }
  0x7c   : > { %796 = vmatpush1.xpose.msra.mxu0 %v321_v26  ;;  %867 = vmatpush1.xpose.msra.mxu1 %v323_v27  ;;  %v483_v13 = vld [vmem:[%s1916_s22 + $0x750] sm:$0xff]  ;;  %v474_v14 = vld [vmem:[%s1916_s22 + $0x708] sm:$0xff]  ;;  %v476_v15 = vld [vmem:[%s1916_s22 + $0x718] sm:$0xff] }
  0x7d   : > { %797 = vmatprep.subr.mxu0 %v314_v28  ;;  %868 = vmatprep.subr.mxu1 %v316_v29  ;;  %v473_v16 = vld [vmem:[%s1916_s22 + $0x700] sm:$0xff]  ;;  %v475_v17 = vld [vmem:[%s1916_s22 + $0x710] sm:$0xff]  ;;  %v466_v18 = vld [vmem:[%s1916_s22 + $0x6c8] sm:$0xff] }
  0x7e   : > { %v468_v19 = vld [vmem:[%s1916_s22 + $0x6d8] sm:$0xff]  ;;  %v465_v20 = vld [vmem:[%s1916_s22 + $0x6c0] sm:$0xff]  ;;  %v467_v21 = vld [vmem:[%s1916_s22 + $0x6d0] sm:$0xff] }
  0x7f   : > { %v458_v22 = vld [vmem:[%s1916_s22 + $0x688] sm:$0xff]  ;;  %v460_v23 = vld [vmem:[%s1916_s22 + $0x698] sm:$0xff]  ;;  %v457_v24 = vld [vmem:[%s1916_s22 + $0x680] sm:$0xff] }
  0x80   : > { %798 = vmatpush1.xpose.msra.mxu0 %v313_v30  ;;  %869 = vmatpush1.xpose.msra.mxu1 %v315_v31  ;;  %v459_v25 = vld [vmem:[%s1916_s22 + $0x690] sm:$0xff]  ;;  %v450_v26 = vld [vmem:[%s1916_s22 + $0x648] sm:$0xff]  ;;  %v452_v27 = vld [vmem:[%s1916_s22 + $0x658] sm:$0xff] }
  0x81   : > { %799 = vmatprep.subr.mxu0 %v306_v32  ;;  %870 = vmatprep.subr.mxu1 %v308_v33  ;;  %v449_v28 = vld [vmem:[%s1916_s22 + $0x640] sm:$0xff]  ;;  %v451_v29 = vld [vmem:[%s1916_s22 + $0x650] sm:$0xff]  ;;  %v442_v30 = vld [vmem:[%s1916_s22 + $0x608] sm:$0xff] }
  0x82   : > { %v444_v31 = vld [vmem:[%s1916_s22 + $0x618] sm:$0xff]  ;;  %v441_v32 = vld [vmem:[%s1916_s22 + $0x600] sm:$0xff]  ;;  %v443_v33 = vld [vmem:[%s1916_s22 + $0x610] sm:$0xff] }
  0x84   : > { %800 = vmatpush1.xpose.msra.mxu0 %v305_v34  ;;  %871 = vmatpush1.xpose.msra.mxu1 %v307_v35  ;;  %v434_v34 = vld [vmem:[%s1916_s22 + $0x5c8] sm:$0xff]  ;;  %v436_v35 = vld [vmem:[%s1916_s22 + $0x5d8] sm:$0xff] }
  0x85   : > { %801 = vmatprep.subr.mxu0 %v298_v36  ;;  %872 = vmatprep.subr.mxu1 %v300_v37  ;;  %v433_v36 = vld [vmem:[%s1916_s22 + $0x5c0] sm:$0xff]  ;;  %v435_v37 = vld [vmem:[%s1916_s22 + $0x5d0] sm:$0xff] }
  0x88   : > { %802 = vmatpush1.xpose.msra.mxu0 %v297_v38  ;;  %873 = vmatpush1.xpose.msra.mxu1 %v299_v39  ;;  %v426_v38 = vld [vmem:[%s1916_s22 + $0x588] sm:$0xff]  ;;  %v428_v39 = vld [vmem:[%s1916_s22 + $0x598] sm:$0xff] }
  0x89   : > { %803 = vmatprep.subr.mxu0 %v290_v40  ;;  %874 = vmatprep.subr.mxu1 %v292_v41  ;;  %v425_v40 = vld [vmem:[%s1916_s22 + $0x580] sm:$0xff]  ;;  %v427_v41 = vld [vmem:[%s1916_s22 + $0x590] sm:$0xff] }
  0x8c   : > { %804 = vmatpush1.xpose.msra.mxu0 %v289_v42  ;;  %875 = vmatpush1.xpose.msra.mxu1 %v291_v43  ;;  %v418_v42 = vld [vmem:[%s1916_s22 + $0x548] sm:$0xff]  ;;  %v420_v43 = vld [vmem:[%s1916_s22 + $0x558] sm:$0xff] }
  0x8d   : > { %805 = vmatprep.subr.mxu0 %v282_v44  ;;  %876 = vmatprep.subr.mxu1 %v284_v45  ;;  %v417_v44 = vld [vmem:[%s1916_s22 + $0x540] sm:$0xff]  ;;  %v419_v45 = vld [vmem:[%s1916_s22 + $0x550] sm:$0xff] }
  0x90   : > { %806 = vmatpush1.xpose.msra.mxu0 %v281_v47  ;;  %877 = vmatpush1.xpose.msra.mxu1 %v283_v48  ;;  %v410_v47 = vld [vmem:[%s1916_s22 + $0x508] sm:$0xff]  ;;  %v412_v48 = vld [vmem:[%s1916_s22 + $0x518] sm:$0xff] }
  0x91   : > { %807 = vmatprep.subr.mxu0 %v274_v50  ;;  %878 = vmatprep.subr.mxu1 %v276_v51  ;;  %v409_v50 = vld [vmem:[%s1916_s22 + $0x500] sm:$0xff]  ;;  %v411_v51 = vld [vmem:[%s1916_s22 + $0x510] sm:$0xff] }
  0x94   : > { %808 = vmatpush1.xpose.msra.mxu0 %v273_v52  ;;  %879 = vmatpush1.xpose.msra.mxu1 %v275_v53  ;;  %v402_v52 = vld [vmem:[%s1916_s22 + $0x4c8] sm:$0xff]  ;;  %v404_v53 = vld [vmem:[%s1916_s22 + $0x4d8] sm:$0xff] }
  0x95   : > { %809 = vmatprep.subr.mxu0 %v266_v54  ;;  %880 = vmatprep.subr.mxu1 %v268_v55  ;;  %v401_v54 = vld [vmem:[%s1916_s22 + $0x4c0] sm:$0xff]  ;;  %v403_v55 = vld [vmem:[%s1916_s22 + $0x4d0] sm:$0xff] }
  0x98   : > { %810 = vmatpush1.xpose.msra.mxu0 %v265_v56  ;;  %881 = vmatpush1.xpose.msra.mxu1 %v267_v57  ;;  %v394_v56 = vld [vmem:[%s1916_s22 + $0x488] sm:$0xff]  ;;  %v396_v57 = vld [vmem:[%s1916_s22 + $0x498] sm:$0xff] }
  0x99   : > { %811 = vmatprep.subr.mxu0 %v258_v58  ;;  %882 = vmatprep.subr.mxu1 %v260_v59  ;;  %v393_v58 = vld [vmem:[%s1916_s22 + $0x480] sm:$0xff]  ;;  %v395_v59 = vld [vmem:[%s1916_s22 + $0x490] sm:$0xff] }
  0x9c   : > { %812 = vmatpush1.xpose.msra.mxu0 %v257_v60  ;;  %883 = vmatpush1.xpose.msra.mxu1 %v259_v61  ;;  %v386_v60 = vld [vmem:[%s1916_s22 + $0x448] sm:$0xff]  ;;  %v388_v61 = vld [vmem:[%s1916_s22 + $0x458] sm:$0xff] }
  0x9d   : > { %813 = vmatprep.subr.mxu0 %v250_v62  ;;  %884 = vmatprep.subr.mxu1 %v252_v63  ;;  %v385_v62 = vld [vmem:[%s1916_s22 + $0x440] sm:$0xff]  ;;  %v387_v63 = vld [vmem:[%s1916_s22 + $0x450] sm:$0xff] }
  0xa0   : > { %814 = vmatpush1.xpose.msra.mxu0 %v249_v0  ;;  %885 = vmatpush1.xpose.msra.mxu1 %v251_v1  ;;  %v378_v0 = vld [vmem:[%s1916_s22 + $0x408] sm:$0xff]  ;;  %v380_v1 = vld [vmem:[%s1916_s22 + $0x418] sm:$0xff] }
  0xa1   : > { %815 = vmatprep.subr.mxu0 %v498_v2  ;;  %886 = vmatprep.subr.mxu1 %v500_v3  ;;  %v377_v2 = vld [vmem:[%s1916_s22 + $0x400] sm:$0xff]  ;;  %v379_v3 = vld [vmem:[%s1916_s22 + $0x410] sm:$0xff] }
  0xa4   : > { %816 = vmatpush2.xpose.msra.mxu0 %v497_v4  ;;  %887 = vmatpush2.xpose.msra.mxu1 %v499_v5  ;;  %v374_v4 = vld [vmem:[%s1916_s22 + $0x3e8] sm:$0xff]  ;;  %v376_v5 = vld [vmem:[%s1916_s22 + $0x3f8] sm:$0xff] }
  0xa5   : > { %817 = vmatprep.subr.mxu0 %v490_v6  ;;  %888 = vmatprep.subr.mxu1 %v492_v7  ;;  %v241_v6 = vld [vmem:[#allocation2] sm:$0xff]  ;;  %v243_v7 = vld [vmem:[#allocation2 + $0x10] sm:$0xff] }
  0xa8   : > { %818 = vmatpush2.xpose.msra.mxu0 %v489_v8  ;;  %889 = vmatpush2.xpose.msra.mxu1 %v491_v9  ;;  %v373_v8 = vld [vmem:[%s1916_s22 + $0x3e0] sm:$0xff]  ;;  %v375_v9 = vld [vmem:[%s1916_s22 + $0x3f0] sm:$0xff] }
  0xa9   : > { %819 = vmatprep.subr.mxu0 %v482_v10  ;;  %890 = vmatprep.subr.mxu1 %v484_v11  ;;  %v366_v10 = vld [vmem:[%s1916_s22 + $0x3a8] sm:$0xff]  ;;  %v368_v11 = vld [vmem:[%s1916_s22 + $0x3b8] sm:$0xff] }
  0xac   : > { %820 = vmatpush2.xpose.msra.mxu0 %v481_v12  ;;  %891 = vmatpush2.xpose.msra.mxu1 %v483_v13  ;;  %v246_v12 = vld [vmem:[#allocation2 + $0x28] sm:$0xff]  ;;  %v248_v13 = vld [vmem:[#allocation2 + $0x38] sm:$0xff] }
  0xad   : > { %821 = vmatprep.subr.mxu0 %v474_v14  ;;  %892 = vmatprep.subr.mxu1 %v476_v15  ;;  %v365_v14 = vld [vmem:[%s1916_s22 + $0x3a0] sm:$0xff]  ;;  %v367_v15 = vld [vmem:[%s1916_s22 + $0x3b0] sm:$0xff] }
  0xb0   : > { %822 = vmatpush2.xpose.msra.mxu0 %v473_v16  ;;  %893 = vmatpush2.xpose.msra.mxu1 %v475_v17  ;;  %v358_v16 = vld [vmem:[%s1916_s22 + $0x368] sm:$0xff]  ;;  %v360_v17 = vld [vmem:[%s1916_s22 + $0x378] sm:$0xff] }
  0xb1   : > { %823 = vmatprep.subr.mxu0 %v466_v18  ;;  %894 = vmatprep.subr.mxu1 %v468_v19  ;;  %v357_v18 = vld [vmem:[%s1916_s22 + $0x360] sm:$0xff]  ;;  %v359_v19 = vld [vmem:[%s1916_s22 + $0x370] sm:$0xff] }
  0xb4   : > { %824 = vmatpush2.xpose.msra.mxu0 %v465_v20  ;;  %895 = vmatpush2.xpose.msra.mxu1 %v467_v21  ;;  %v350_v20 = vld [vmem:[%s1916_s22 + $0x328] sm:$0xff]  ;;  %v352_v21 = vld [vmem:[%s1916_s22 + $0x338] sm:$0xff] }
  0xb5   : > { %825 = vmatprep.subr.mxu0 %v458_v22  ;;  %896 = vmatprep.subr.mxu1 %v460_v23  ;;  %v349_v22 = vld [vmem:[%s1916_s22 + $0x320] sm:$0xff]  ;;  %v351_v23 = vld [vmem:[%s1916_s22 + $0x330] sm:$0xff] }
  0xb8   : > { %826 = vmatpush2.xpose.msra.mxu0 %v457_v24  ;;  %897 = vmatpush2.xpose.msra.mxu1 %v459_v25  ;;  %v342_v24 = vld [vmem:[%s1916_s22 + $0x2e8] sm:$0xff]  ;;  %v344_v25 = vld [vmem:[%s1916_s22 + $0x2f8] sm:$0xff] }
  0xb9   : > { %827 = vmatprep.subr.mxu0 %v450_v26  ;;  %898 = vmatprep.subr.mxu1 %v452_v27  ;;  %v341_v26 = vld [vmem:[%s1916_s22 + $0x2e0] sm:$0xff]  ;;  %v343_v27 = vld [vmem:[%s1916_s22 + $0x2f0] sm:$0xff] }
  0xbc   : > { %828 = vmatpush2.xpose.msra.mxu0 %v449_v28  ;;  %899 = vmatpush2.xpose.msra.mxu1 %v451_v29  ;;  %v334_v28 = vld [vmem:[%s1916_s22 + $0x2a8] sm:$0xff]  ;;  %v336_v29 = vld [vmem:[%s1916_s22 + $0x2b8] sm:$0xff] }
  0xbd   : > { %829 = vmatprep.subr.mxu0 %v442_v30  ;;  %900 = vmatprep.subr.mxu1 %v444_v31  ;;  %v333_v30 = vld [vmem:[%s1916_s22 + $0x2a0] sm:$0xff]  ;;  %v335_v31 = vld [vmem:[%s1916_s22 + $0x2b0] sm:$0xff] }
  0xc0   : > { %830 = vmatpush2.xpose.msra.mxu0 %v441_v32  ;;  %901 = vmatpush2.xpose.msra.mxu1 %v443_v33  ;;  %v326_v32 = vld [vmem:[%s1916_s22 + $0x268] sm:$0xff]  ;;  %v328_v33 = vld [vmem:[%s1916_s22 + $0x278] sm:$0xff] }
  0xc1   : > { %831 = vmatprep.subr.mxu0 %v434_v34  ;;  %902 = vmatprep.subr.mxu1 %v436_v35  ;;  %v325_v34 = vld [vmem:[%s1916_s22 + $0x260] sm:$0xff]  ;;  %v327_v35 = vld [vmem:[%s1916_s22 + $0x270] sm:$0xff] }
  0xc4   : > { %832 = vmatpush2.xpose.msra.mxu0 %v433_v36  ;;  %903 = vmatpush2.xpose.msra.mxu1 %v435_v37  ;;  %v318_v36 = vld [vmem:[%s1916_s22 + $0x228] sm:$0xff]  ;;  %v320_v37 = vld [vmem:[%s1916_s22 + $0x238] sm:$0xff] }
  0xc5   : > { %833 = vmatprep.subr.mxu0 %v426_v38  ;;  %904 = vmatprep.subr.mxu1 %v428_v39  ;;  %v317_v38 = vld [vmem:[%s1916_s22 + $0x220] sm:$0xff]  ;;  %v319_v39 = vld [vmem:[%s1916_s22 + $0x230] sm:$0xff] }
  0xc8   : > { %834 = vmatpush2.xpose.msra.mxu0 %v425_v40  ;;  %905 = vmatpush2.xpose.msra.mxu1 %v427_v41  ;;  %v310_v40 = vld [vmem:[%s1916_s22 + $0x1e8] sm:$0xff]  ;;  %v312_v41 = vld [vmem:[%s1916_s22 + $0x1f8] sm:$0xff] }
  0xc9   : > { %835 = vmatprep.subr.mxu0 %v418_v42  ;;  %906 = vmatprep.subr.mxu1 %v420_v43  ;;  %v309_v42 = vld [vmem:[%s1916_s22 + $0x1e0] sm:$0xff]  ;;  %v311_v43 = vld [vmem:[%s1916_s22 + $0x1f0] sm:$0xff] }
  0xcc   : > { %836 = vmatpush2.xpose.msra.mxu0 %v417_v44  ;;  %907 = vmatpush2.xpose.msra.mxu1 %v419_v45  ;;  %v302_v44 = vld [vmem:[%s1916_s22 + $0x1a8] sm:$0xff]  ;;  %v304_v45 = vld [vmem:[%s1916_s22 + $0x1b8] sm:$0xff] }
  0xcd   : > { %837 = vmatprep.subr.mxu0 %v410_v47  ;;  %908 = vmatprep.subr.mxu1 %v412_v48  ;;  %v301_v47 = vld [vmem:[%s1916_s22 + $0x1a0] sm:$0xff]  ;;  %v303_v48 = vld [vmem:[%s1916_s22 + $0x1b0] sm:$0xff] }
  0xd0   : > { %838 = vmatpush2.xpose.msra.mxu0 %v409_v50  ;;  %909 = vmatpush2.xpose.msra.mxu1 %v411_v51  ;;  %v294_v50 = vld [vmem:[%s1916_s22 + $0x168] sm:$0xff]  ;;  %v296_v51 = vld [vmem:[%s1916_s22 + $0x178] sm:$0xff] }
  0xd1   : > { %839 = vmatprep.subr.mxu0 %v402_v52  ;;  %910 = vmatprep.subr.mxu1 %v404_v53  ;;  %v293_v52 = vld [vmem:[%s1916_s22 + $0x160] sm:$0xff]  ;;  %v295_v53 = vld [vmem:[%s1916_s22 + $0x170] sm:$0xff] }
  0xd4   : > { %840 = vmatpush2.xpose.msra.mxu0 %v401_v54  ;;  %911 = vmatpush2.xpose.msra.mxu1 %v403_v55  ;;  %v286_v54 = vld [vmem:[%s1916_s22 + $0x128] sm:$0xff]  ;;  %v288_v55 = vld [vmem:[%s1916_s22 + $0x138] sm:$0xff] }
  0xd5   : > { %841 = vmatprep.subr.mxu0 %v394_v56  ;;  %912 = vmatprep.subr.mxu1 %v396_v57  ;;  %v285_v56 = vld [vmem:[%s1916_s22 + $0x120] sm:$0xff]  ;;  %v287_v57 = vld [vmem:[%s1916_s22 + $0x130] sm:$0xff] }
  0xd8   : > { %842 = vmatpush2.xpose.msra.mxu0 %v393_v58  ;;  %913 = vmatpush2.xpose.msra.mxu1 %v395_v59  ;;  %v278_v58 = vld [vmem:[%s1916_s22 + $0xe8] sm:$0xff]  ;;  %v280_v59 = vld [vmem:[%s1916_s22 + $0xf8] sm:$0xff] }
  0xd9   : > { %843 = vmatprep.subr.mxu0 %v386_v60  ;;  %914 = vmatprep.subr.mxu1 %v388_v61  ;;  %v277_v60 = vld [vmem:[%s1916_s22 + $0xe0] sm:$0xff]  ;;  %v279_v61 = vld [vmem:[%s1916_s22 + $0xf0] sm:$0xff] }
  0xdc   : > { %844 = vmatpush2.xpose.msra.mxu0 %v385_v62  ;;  %915 = vmatpush2.xpose.msra.mxu1 %v387_v63  ;;  %v270_v62 = vld [vmem:[%s1916_s22 + $0xa8] sm:$0xff]  ;;  %v272_v63 = vld [vmem:[%s1916_s22 + $0xb8] sm:$0xff] }
  0xdd   : > { %845 = vmatprep.subr.mxu0 %v378_v0  ;;  %916 = vmatprep.subr.mxu1 %v380_v1  ;;  %v269_v0 = vld [vmem:[%s1916_s22 + $0xa0] sm:$0xff]  ;;  %v271_v1 = vld [vmem:[%s1916_s22 + $0xb0] sm:$0xff] }
  0xe0   : > { %846 = vmatpush2.xpose.msra.mxu0 %v377_v2  ;;  %917 = vmatpush2.xpose.msra.mxu1 %v379_v3  ;;  %v262_v2 = vld [vmem:[%s1916_s22 + $0x68] sm:$0xff]  ;;  %v264_v3 = vld [vmem:[%s1916_s22 + $0x78] sm:$0xff] }
  0xe1   : > { %925 = vmatprep.subr.mxu0 %v374_v4  ;;  %996 = vmatprep.subr.mxu1 %v376_v5  ;;  %v261_v4 = vld [vmem:[%s1916_s22 + $0x60] sm:$0xff]  ;;  %v263_v5 = vld [vmem:[%s1916_s22 + $0x70] sm:$0xff] }
  0xe3   : > { %848 = vmatmul.mubr.f32.vlgmr.msra.gmra.mxu0 %v241_v6  ;;  %919 = vmatmul.mubr.f32.vlgmr.msra.gmra.mxu1 %v243_v7  ;;  %v254_v6 = vld [vmem:[%s1916_s22 + $0x28] sm:$0xff]  ;;  %v256_v7 = vld [vmem:[%s1916_s22 + $0x38] sm:$0xff] }
  0xe4   : > { %926 = vmatpush1.xpose.msra.mxu0 %v373_v8  ;;  %997 = vmatpush1.xpose.msra.mxu1 %v375_v9  ;;  %v253_v8 = vld [vmem:[%s1916_s22 + $0x20] sm:$0xff]  ;;  %v255_v9 = vld [vmem:[%s1916_s22 + $0x30] sm:$0xff] }
  0xe5   : > { %927 = vmatprep.subr.mxu0 %v366_v10  ;;  %998 = vmatprep.subr.mxu1 %v368_v11  ;;  %v502_v10 = vld [vmem:[%s1916_s22 + $0x7e8] sm:$0xff]  ;;  %v504_v11 = vld [vmem:[%s1916_s22 + $0x7f8] sm:$0xff] }
  0xe6   : > { %989 = vmatprep.mubr.f32.mxu0 %v246_v12  ;;  %1060 = vmatprep.mubr.f32.mxu1 %v248_v13  ;;  %v501_v12 = vld [vmem:[%s1916_s22 + $0x7e0] sm:$0xff]  ;;  %v503_v13 = vld [vmem:[%s1916_s22 + $0x7f0] sm:$0xff] }
  0xe8   : > { %928 = vmatpush1.xpose.msra.mxu0 %v365_v14  ;;  %999 = vmatpush1.xpose.msra.mxu1 %v367_v15  ;;  %v494_v14 = vld [vmem:[%s1916_s22 + $0x7a8] sm:$0xff]  ;;  %v496_v15 = vld [vmem:[%s1916_s22 + $0x7b8] sm:$0xff] }
  0xe9   : > { %929 = vmatprep.subr.mxu0 %v358_v16  ;;  %1000 = vmatprep.subr.mxu1 %v360_v17  ;;  %v493_v16 = vld [vmem:[%s1916_s22 + $0x7a0] sm:$0xff]  ;;  %v495_v17 = vld [vmem:[%s1916_s22 + $0x7b0] sm:$0xff] }
  0xec   : > { %930 = vmatpush1.xpose.msra.mxu0 %v357_v18  ;;  %1001 = vmatpush1.xpose.msra.mxu1 %v359_v19  ;;  %v486_v18 = vld [vmem:[%s1916_s22 + $0x768] sm:$0xff]  ;;  %v488_v19 = vld [vmem:[%s1916_s22 + $0x778] sm:$0xff] }
  0xed   : > { %931 = vmatprep.subr.mxu0 %v350_v20  ;;  %1002 = vmatprep.subr.mxu1 %v352_v21  ;;  %v485_v20 = vld [vmem:[%s1916_s22 + $0x760] sm:$0xff]  ;;  %v487_v21 = vld [vmem:[%s1916_s22 + $0x770] sm:$0xff] }
  0xf0   : > { %932 = vmatpush1.xpose.msra.mxu0 %v349_v22  ;;  %1003 = vmatpush1.xpose.msra.mxu1 %v351_v23  ;;  %v478_v22 = vld [vmem:[%s1916_s22 + $0x728] sm:$0xff]  ;;  %v480_v23 = vld [vmem:[%s1916_s22 + $0x738] sm:$0xff] }
  0xf1   : > { %933 = vmatprep.subr.mxu0 %v342_v24  ;;  %1004 = vmatprep.subr.mxu1 %v344_v25  ;;  %v477_v24 = vld [vmem:[%s1916_s22 + $0x720] sm:$0xff]  ;;  %v479_v25 = vld [vmem:[%s1916_s22 + $0x730] sm:$0xff] }
  0xf4   : > { %934 = vmatpush1.xpose.msra.mxu0 %v341_v26  ;;  %1005 = vmatpush1.xpose.msra.mxu1 %v343_v27  ;;  %v470_v26 = vld [vmem:[%s1916_s22 + $0x6e8] sm:$0xff]  ;;  %v472_v27 = vld [vmem:[%s1916_s22 + $0x6f8] sm:$0xff] }
  0xf5   : > { %935 = vmatprep.subr.mxu0 %v334_v28  ;;  %1006 = vmatprep.subr.mxu1 %v336_v29  ;;  %v469_v28 = vld [vmem:[%s1916_s22 + $0x6e0] sm:$0xff]  ;;  %v471_v29 = vld [vmem:[%s1916_s22 + $0x6f0] sm:$0xff] }
  0xf8   : > { %936 = vmatpush1.xpose.msra.mxu0 %v333_v30  ;;  %1007 = vmatpush1.xpose.msra.mxu1 %v335_v31  ;;  %v462_v30 = vld [vmem:[%s1916_s22 + $0x6a8] sm:$0xff]  ;;  %v464_v31 = vld [vmem:[%s1916_s22 + $0x6b8] sm:$0xff] }
  0xf9   : > { %937 = vmatprep.subr.mxu0 %v326_v32  ;;  %1008 = vmatprep.subr.mxu1 %v328_v33  ;;  %v461_v32 = vld [vmem:[%s1916_s22 + $0x6a0] sm:$0xff]  ;;  %v463_v33 = vld [vmem:[%s1916_s22 + $0x6b0] sm:$0xff] }
  0xfc   : > { %938 = vmatpush1.xpose.msra.mxu0 %v325_v34  ;;  %1009 = vmatpush1.xpose.msra.mxu1 %v327_v35  ;;  %v454_v34 = vld [vmem:[%s1916_s22 + $0x668] sm:$0xff]  ;;  %v456_v35 = vld [vmem:[%s1916_s22 + $0x678] sm:$0xff] }
  0xfd   : > { %939 = vmatprep.subr.mxu0 %v318_v36  ;;  %1010 = vmatprep.subr.mxu1 %v320_v37  ;;  %v453_v36 = vld [vmem:[%s1916_s22 + $0x660] sm:$0xff]  ;;  %v455_v37 = vld [vmem:[%s1916_s22 + $0x670] sm:$0xff] }
 0x100   : > { %940 = vmatpush1.xpose.msra.mxu0 %v317_v38  ;;  %1011 = vmatpush1.xpose.msra.mxu1 %v319_v39  ;;  %v446_v38 = vld [vmem:[%s1916_s22 + $0x628] sm:$0xff]  ;;  %v448_v39 = vld [vmem:[%s1916_s22 + $0x638] sm:$0xff] }
 0x101   : > { %941 = vmatprep.subr.mxu0 %v310_v40  ;;  %1012 = vmatprep.subr.mxu1 %v312_v41  ;;  %v445_v40 = vld [vmem:[%s1916_s22 + $0x620] sm:$0xff]  ;;  %v447_v41 = vld [vmem:[%s1916_s22 + $0x630] sm:$0xff] }
 0x104   : > { %942 = vmatpush1.xpose.msra.mxu0 %v309_v42  ;;  %1013 = vmatpush1.xpose.msra.mxu1 %v311_v43  ;;  %v438_v42 = vld [vmem:[%s1916_s22 + $0x5e8] sm:$0xff]  ;;  %v440_v43 = vld [vmem:[%s1916_s22 + $0x5f8] sm:$0xff] }
 0x105   : > { %943 = vmatprep.subr.mxu0 %v302_v44  ;;  %1014 = vmatprep.subr.mxu1 %v304_v45  ;;  %v437_v44 = vld [vmem:[%s1916_s22 + $0x5e0] sm:$0xff]  ;;  %v439_v45 = vld [vmem:[%s1916_s22 + $0x5f0] sm:$0xff] }
 0x108   : > { %944 = vmatpush1.xpose.msra.mxu0 %v301_v47  ;;  %1015 = vmatpush1.xpose.msra.mxu1 %v303_v48  ;;  %v430_v47 = vld [vmem:[%s1916_s22 + $0x5a8] sm:$0xff]  ;;  %v432_v48 = vld [vmem:[%s1916_s22 + $0x5b8] sm:$0xff] }
 0x109   : > { %945 = vmatprep.subr.mxu0 %v294_v50  ;;  %1016 = vmatprep.subr.mxu1 %v296_v51  ;;  %v429_v50 = vld [vmem:[%s1916_s22 + $0x5a0] sm:$0xff]  ;;  %v431_v51 = vld [vmem:[%s1916_s22 + $0x5b0] sm:$0xff] }
 0x10c   : > { %946 = vmatpush1.xpose.msra.mxu0 %v293_v52  ;;  %1017 = vmatpush1.xpose.msra.mxu1 %v295_v53  ;;  %v422_v52 = vld [vmem:[%s1916_s22 + $0x568] sm:$0xff]  ;;  %v424_v53 = vld [vmem:[%s1916_s22 + $0x578] sm:$0xff] }
 0x10d   : > { %947 = vmatprep.subr.mxu0 %v286_v54  ;;  %1018 = vmatprep.subr.mxu1 %v288_v55  ;;  %v421_v54 = vld [vmem:[%s1916_s22 + $0x560] sm:$0xff]  ;;  %v423_v55 = vld [vmem:[%s1916_s22 + $0x570] sm:$0xff] }
 0x110   : > { %948 = vmatpush1.xpose.msra.mxu0 %v285_v56  ;;  %1019 = vmatpush1.xpose.msra.mxu1 %v287_v57  ;;  %v414_v56 = vld [vmem:[%s1916_s22 + $0x528] sm:$0xff]  ;;  %v416_v57 = vld [vmem:[%s1916_s22 + $0x538] sm:$0xff] }
 0x111   : > { %949 = vmatprep.subr.mxu0 %v278_v58  ;;  %1020 = vmatprep.subr.mxu1 %v280_v59  ;;  %v413_v58 = vld [vmem:[%s1916_s22 + $0x520] sm:$0xff]  ;;  %v415_v59 = vld [vmem:[%s1916_s22 + $0x530] sm:$0xff] }
 0x114   : > { %950 = vmatpush1.xpose.msra.mxu0 %v277_v60  ;;  %1021 = vmatpush1.xpose.msra.mxu1 %v279_v61  ;;  %v406_v60 = vld [vmem:[%s1916_s22 + $0x4e8] sm:$0xff]  ;;  %v408_v61 = vld [vmem:[%s1916_s22 + $0x4f8] sm:$0xff] }
 0x115   : > { %951 = vmatprep.subr.mxu0 %v270_v62  ;;  %1022 = vmatprep.subr.mxu1 %v272_v63  ;;  %v405_v62 = vld [vmem:[%s1916_s22 + $0x4e0] sm:$0xff]  ;;  %v407_v63 = vld [vmem:[%s1916_s22 + $0x4f0] sm:$0xff] }
 0x118   : > { %952 = vmatpush1.xpose.msra.mxu0 %v269_v0  ;;  %1023 = vmatpush1.xpose.msra.mxu1 %v271_v1  ;;  %v398_v0 = vld [vmem:[%s1916_s22 + $0x4a8] sm:$0xff]  ;;  %v400_v1 = vld [vmem:[%s1916_s22 + $0x4b8] sm:$0xff] }
 0x119   : > { %953 = vmatprep.subr.mxu0 %v262_v2  ;;  %1024 = vmatprep.subr.mxu1 %v264_v3  ;;  %v397_v2 = vld [vmem:[%s1916_s22 + $0x4a0] sm:$0xff]  ;;  %v399_v3 = vld [vmem:[%s1916_s22 + $0x4b0] sm:$0xff] }
 0x11c   : > { %954 = vmatpush1.xpose.msra.mxu0 %v261_v4  ;;  %1025 = vmatpush1.xpose.msra.mxu1 %v263_v5  ;;  %v390_v4 = vld [vmem:[%s1916_s22 + $0x468] sm:$0xff]  ;;  %v392_v5 = vld [vmem:[%s1916_s22 + $0x478] sm:$0xff] }
 0x11d   : > { %955 = vmatprep.subr.mxu0 %v254_v6  ;;  %1026 = vmatprep.subr.mxu1 %v256_v7  ;;  %v389_v6 = vld [vmem:[%s1916_s22 + $0x460] sm:$0xff]  ;;  %v391_v7 = vld [vmem:[%s1916_s22 + $0x470] sm:$0xff] }
 0x120   : > { %956 = vmatpush1.xpose.msra.mxu0 %v253_v8  ;;  %1027 = vmatpush1.xpose.msra.mxu1 %v255_v9  ;;  %v382_v8 = vld [vmem:[%s1916_s22 + $0x428] sm:$0xff]  ;;  %v384_v9 = vld [vmem:[%s1916_s22 + $0x438] sm:$0xff] }
 0x121   : > { %957 = vmatprep.subr.mxu0 %v502_v10  ;;  %1028 = vmatprep.subr.mxu1 %v504_v11  ;;  %v381_v10 = vld [vmem:[%s1916_s22 + $0x420] sm:$0xff]  ;;  %v383_v11 = vld [vmem:[%s1916_s22 + $0x430] sm:$0xff] }
 0x124   : > { %958 = vmatpush2.xpose.msra.mxu0 %v501_v12  ;;  %1029 = vmatpush2.xpose.msra.mxu1 %v503_v13  ;;  %v626_v12 = vld [vmem:[%s1916_s22 + $0xbc8] sm:$0xff]  ;;  %v628_v13 = vld [vmem:[%s1916_s22 + $0xbd8] sm:$0xff] }
 0x125   : > { %959 = vmatprep.subr.mxu0 %v494_v14  ;;  %1030 = vmatprep.subr.mxu1 %v496_v15  ;;  %v245_v14 = vld [vmem:[#allocation2 + $0x20] sm:$0xff]  ;;  %v247_v15 = vld [vmem:[#allocation2 + $0x30] sm:$0xff] }
 0x128   : > { %960 = vmatpush2.xpose.msra.mxu0 %v493_v16  ;;  %1031 = vmatpush2.xpose.msra.mxu1 %v495_v17  ;;  %v625_v16 = vld [vmem:[%s1916_s22 + $0xbc0] sm:$0xff]  ;;  %v627_v17 = vld [vmem:[%s1916_s22 + $0xbd0] sm:$0xff] }
 0x129   : > { %961 = vmatprep.subr.mxu0 %v486_v18  ;;  %1032 = vmatprep.subr.mxu1 %v488_v19  ;;  %v618_v18 = vld [vmem:[%s1916_s22 + $0xb88] sm:$0xff]  ;;  %v620_v19 = vld [vmem:[%s1916_s22 + $0xb98] sm:$0xff] }
 0x12c   : > { %962 = vmatpush2.xpose.msra.mxu0 %v485_v20  ;;  %1033 = vmatpush2.xpose.msra.mxu1 %v487_v21  ;;  %v617_v20 = vld [vmem:[%s1916_s22 + $0xb80] sm:$0xff]  ;;  %v619_v21 = vld [vmem:[%s1916_s22 + $0xb90] sm:$0xff] }
 0x12d   : > { %963 = vmatprep.subr.mxu0 %v478_v22  ;;  %1034 = vmatprep.subr.mxu1 %v480_v23  ;;  %v610_v22 = vld [vmem:[%s1916_s22 + $0xb48] sm:$0xff]  ;;  %v612_v23 = vld [vmem:[%s1916_s22 + $0xb58] sm:$0xff] }
 0x130   : > { %964 = vmatpush2.xpose.msra.mxu0 %v477_v24  ;;  %1035 = vmatpush2.xpose.msra.mxu1 %v479_v25  ;;  %v609_v24 = vld [vmem:[%s1916_s22 + $0xb40] sm:$0xff]  ;;  %v611_v25 = vld [vmem:[%s1916_s22 + $0xb50] sm:$0xff] }
 0x131   : > { %965 = vmatprep.subr.mxu0 %v470_v26  ;;  %1036 = vmatprep.subr.mxu1 %v472_v27  ;;  %v602_v26 = vld [vmem:[%s1916_s22 + $0xb08] sm:$0xff]  ;;  %v604_v27 = vld [vmem:[%s1916_s22 + $0xb18] sm:$0xff] }
 0x134   : > { %966 = vmatpush2.xpose.msra.mxu0 %v469_v28  ;;  %1037 = vmatpush2.xpose.msra.mxu1 %v471_v29  ;;  %v594_v28 = vld [vmem:[%s1916_s22 + $0xac8] sm:$0xff]  ;;  %v596_v29 = vld [vmem:[%s1916_s22 + $0xad8] sm:$0xff] }
 0x135   : > { %967 = vmatprep.subr.mxu0 %v462_v30  ;;  %1038 = vmatprep.subr.mxu1 %v464_v31  ;;  %v593_v30 = vld [vmem:[%s1916_s22 + $0xac0] sm:$0xff]  ;;  %v595_v31 = vld [vmem:[%s1916_s22 + $0xad0] sm:$0xff] }
 0x138   : > { %968 = vmatpush2.xpose.msra.mxu0 %v461_v32  ;;  %1039 = vmatpush2.xpose.msra.mxu1 %v463_v33  ;;  %v586_v32 = vld [vmem:[%s1916_s22 + $0xa88] sm:$0xff]  ;;  %v588_v33 = vld [vmem:[%s1916_s22 + $0xa98] sm:$0xff] }
 0x139   : > { %969 = vmatprep.subr.mxu0 %v454_v34  ;;  %1040 = vmatprep.subr.mxu1 %v456_v35  ;;  %v585_v34 = vld [vmem:[%s1916_s22 + $0xa80] sm:$0xff]  ;;  %v587_v35 = vld [vmem:[%s1916_s22 + $0xa90] sm:$0xff] }
 0x13c   : > { %970 = vmatpush2.xpose.msra.mxu0 %v453_v36  ;;  %1041 = vmatpush2.xpose.msra.mxu1 %v455_v37  ;;  %v578_v36 = vld [vmem:[%s1916_s22 + $0xa48] sm:$0xff]  ;;  %v580_v37 = vld [vmem:[%s1916_s22 + $0xa58] sm:$0xff] }
 0x13d   : > { %971 = vmatprep.subr.mxu0 %v446_v38  ;;  %1042 = vmatprep.subr.mxu1 %v448_v39  ;;  %v577_v38 = vld [vmem:[%s1916_s22 + $0xa40] sm:$0xff]  ;;  %v579_v39 = vld [vmem:[%s1916_s22 + $0xa50] sm:$0xff] }
 0x140   : > { %972 = vmatpush2.xpose.msra.mxu0 %v445_v40  ;;  %1043 = vmatpush2.xpose.msra.mxu1 %v447_v41  ;;  %v570_v40 = vld [vmem:[%s1916_s22 + $0xa08] sm:$0xff]  ;;  %v572_v41 = vld [vmem:[%s1916_s22 + $0xa18] sm:$0xff] }
 0x141   : > { %973 = vmatprep.subr.mxu0 %v438_v42  ;;  %1044 = vmatprep.subr.mxu1 %v440_v43  ;;  %v569_v42 = vld [vmem:[%s1916_s22 + $0xa00] sm:$0xff]  ;;  %v571_v43 = vld [vmem:[%s1916_s22 + $0xa10] sm:$0xff] }
 0x144   : > { %974 = vmatpush2.xpose.msra.mxu0 %v437_v44  ;;  %1045 = vmatpush2.xpose.msra.mxu1 %v439_v45  ;;  %v562_v44 = vld [vmem:[%s1916_s22 + $0x9c8] sm:$0xff]  ;;  %v564_v45 = vld [vmem:[%s1916_s22 + $0x9d8] sm:$0xff] }
 0x145   : > { %975 = vmatprep.subr.mxu0 %v430_v47  ;;  %1046 = vmatprep.subr.mxu1 %v432_v48  ;;  %v561_v47 = vld [vmem:[%s1916_s22 + $0x9c0] sm:$0xff]  ;;  %v563_v48 = vld [vmem:[%s1916_s22 + $0x9d0] sm:$0xff] }
 0x148   : > { %976 = vmatpush2.xpose.msra.mxu0 %v429_v50  ;;  %1047 = vmatpush2.xpose.msra.mxu1 %v431_v51  ;;  %v554_v50 = vld [vmem:[%s1916_s22 + $0x988] sm:$0xff]  ;;  %v556_v51 = vld [vmem:[%s1916_s22 + $0x998] sm:$0xff] }
 0x149   : > { %977 = vmatprep.subr.mxu0 %v422_v52  ;;  %1048 = vmatprep.subr.mxu1 %v424_v53  ;;  %v553_v52 = vld [vmem:[%s1916_s22 + $0x980] sm:$0xff]  ;;  %v555_v53 = vld [vmem:[%s1916_s22 + $0x990] sm:$0xff] }
 0x14c   : > { %978 = vmatpush2.xpose.msra.mxu0 %v421_v54  ;;  %1049 = vmatpush2.xpose.msra.mxu1 %v423_v55  ;;  %v546_v54 = vld [vmem:[%s1916_s22 + $0x948] sm:$0xff]  ;;  %v548_v55 = vld [vmem:[%s1916_s22 + $0x958] sm:$0xff] }
 0x14d   : > { %979 = vmatprep.subr.mxu0 %v414_v56  ;;  %1050 = vmatprep.subr.mxu1 %v416_v57  ;;  %v545_v56 = vld [vmem:[%s1916_s22 + $0x940] sm:$0xff]  ;;  %v547_v57 = vld [vmem:[%s1916_s22 + $0x950] sm:$0xff] }
 0x150   : > { %980 = vmatpush2.xpose.msra.mxu0 %v413_v58  ;;  %1051 = vmatpush2.xpose.msra.mxu1 %v415_v59  ;;  %v538_v58 = vld [vmem:[%s1916_s22 + $0x908] sm:$0xff]  ;;  %v540_v59 = vld [vmem:[%s1916_s22 + $0x918] sm:$0xff] }
 0x151   : > { %981 = vmatprep.subr.mxu0 %v406_v60  ;;  %1052 = vmatprep.subr.mxu1 %v408_v61  ;;  %v537_v60 = vld [vmem:[%s1916_s22 + $0x900] sm:$0xff]  ;;  %v539_v61 = vld [vmem:[%s1916_s22 + $0x910] sm:$0xff] }
 0x154   : > { %982 = vmatpush2.xpose.msra.mxu0 %v405_v62  ;;  %1053 = vmatpush2.xpose.msra.mxu1 %v407_v63  ;;  %v530_v62 = vld [vmem:[%s1916_s22 + $0x8c8] sm:$0xff]  ;;  %v532_v63 = vld [vmem:[%s1916_s22 + $0x8d8] sm:$0xff] }
 0x155   : > { %983 = vmatprep.subr.mxu0 %v398_v0  ;;  %1054 = vmatprep.subr.mxu1 %v400_v1  ;;  %v529_v0 = vld [vmem:[%s1916_s22 + $0x8c0] sm:$0xff]  ;;  %v531_v1 = vld [vmem:[%s1916_s22 + $0x8d0] sm:$0xff] }
 0x158   : > { %984 = vmatpush2.xpose.msra.mxu0 %v397_v2  ;;  %1055 = vmatpush2.xpose.msra.mxu1 %v399_v3  ;;  %v522_v2 = vld [vmem:[%s1916_s22 + $0x888] sm:$0xff]  ;;  %v524_v3 = vld [vmem:[%s1916_s22 + $0x898] sm:$0xff] }
 0x159   : > { %985 = vmatprep.subr.mxu0 %v390_v4  ;;  %1056 = vmatprep.subr.mxu1 %v392_v5  ;;  %v521_v4 = vld [vmem:[%s1916_s22 + $0x880] sm:$0xff]  ;;  %v523_v5 = vld [vmem:[%s1916_s22 + $0x890] sm:$0xff] }
 0x15c   : > { %986 = vmatpush2.xpose.msra.mxu0 %v389_v6  ;;  %1057 = vmatpush2.xpose.msra.mxu1 %v391_v7  ;;  %v514_v6 = vld [vmem:[%s1916_s22 + $0x848] sm:$0xff]  ;;  %v516_v7 = vld [vmem:[%s1916_s22 + $0x858] sm:$0xff] }
 0x15d   : > { %987 = vmatprep.subr.mxu0 %v382_v8  ;;  %1058 = vmatprep.subr.mxu1 %v384_v9  ;;  %v513_v8 = vld [vmem:[%s1916_s22 + $0x840] sm:$0xff]  ;;  %v515_v9 = vld [vmem:[%s1916_s22 + $0x850] sm:$0xff] }
 0x160   : > { %988 = vmatpush2.xpose.msra.mxu0 %v381_v10  ;;  %1059 = vmatpush2.xpose.msra.mxu1 %v383_v11  ;;  %v506_v10 = vld [vmem:[%s1916_s22 + $0x808] sm:$0xff]  ;;  %v508_v11 = vld [vmem:[%s1916_s22 + $0x818] sm:$0xff] }
 0x161   : > { %1067 = vmatprep.subr.mxu0 %v626_v12  ;;  %1138 = vmatprep.subr.mxu1 %v628_v13  ;;  %v505_v12 = vld [vmem:[%s1916_s22 + $0x800] sm:$0xff]  ;;  %v507_v13 = vld [vmem:[%s1916_s22 + $0x810] sm:$0xff] }
 0x163   : > { %990 = vmatmul.mubr.f32.vlgmr.msra.gmra.mxu0 %v245_v14  ;;  %1061 = vmatmul.mubr.f32.vlgmr.msra.gmra.mxu1 %v247_v15  ;;  %v754_v14 = vld [vmem:[%s1916_s22 + $0xfc8] sm:$0xff]  ;;  %v756_v15 = vld [vmem:[%s1916_s22 + $0xfd8] sm:$0xff] }
 0x164   : > { %1068 = vmatpush1.xpose.msra.mxu0 %v625_v16  ;;  %1139 = vmatpush1.xpose.msra.mxu1 %v627_v17  ;;  %v753_v16 = vld [vmem:[%s1916_s22 + $0xfc0] sm:$0xff]  ;;  %v755_v17 = vld [vmem:[%s1916_s22 + $0xfd0] sm:$0xff] }
 0x165   : > { %1069 = vmatprep.subr.mxu0 %v618_v18  ;;  %1140 = vmatprep.subr.mxu1 %v620_v19  ;;  %v746_v18 = vld [vmem:[%s1916_s22 + $0xf88] sm:$0xff]  ;;  %v748_v19 = vld [vmem:[%s1916_s22 + $0xf98] sm:$0xff] }
 0x166   : > { %1131 = vmatprep.mubr.f32.mxu0 %v1968_v46  ;;  %1202 = vmatprep.mubr.f32.mxu1 %v1972_v49  ;;  %v601_v46 = vld [vmem:[%s1916_s22 + $0xb00] sm:$0xff]  ;;  %v603_v49 = vld [vmem:[%s1916_s22 + $0xb10] sm:$0xff] }
 0x168   : > { %1070 = vmatpush1.xpose.msra.mxu0 %v617_v20  ;;  %1141 = vmatpush1.xpose.msra.mxu1 %v619_v21  ;;  %v745_v20 = vld [vmem:[%s1916_s22 + $0xf80] sm:$0xff]  ;;  %v747_v21 = vld [vmem:[%s1916_s22 + $0xf90] sm:$0xff] }
 0x169   : > { %1071 = vmatprep.subr.mxu0 %v610_v22  ;;  %1142 = vmatprep.subr.mxu1 %v612_v23  ;;  %v738_v22 = vld [vmem:[%s1916_s22 + $0xf48] sm:$0xff]  ;;  %v740_v23 = vld [vmem:[%s1916_s22 + $0xf58] sm:$0xff] }
 0x16c   : > { %1072 = vmatpush1.xpose.msra.mxu0 %v609_v24  ;;  %1143 = vmatpush1.xpose.msra.mxu1 %v611_v25  ;;  %v737_v24 = vld [vmem:[%s1916_s22 + $0xf40] sm:$0xff]  ;;  %v739_v25 = vld [vmem:[%s1916_s22 + $0xf50] sm:$0xff] }
 0x16d   : > { %1073 = vmatprep.subr.mxu0 %v602_v26  ;;  %1144 = vmatprep.subr.mxu1 %v604_v27  ;;  %v730_v26 = vld [vmem:[%s1916_s22 + $0xf08] sm:$0xff]  ;;  %v732_v27 = vld [vmem:[%s1916_s22 + $0xf18] sm:$0xff] }
 0x170   : > { %1074 = vmatpush1.xpose.msra.mxu0 %v601_v46  ;;  %1145 = vmatpush1.xpose.msra.mxu1 %v603_v49  ;;  %v729_v46 = vld [vmem:[%s1916_s22 + $0xf00] sm:$0xff]  ;;  %v731_v49 = vld [vmem:[%s1916_s22 + $0xf10] sm:$0xff] }
 0x171   : > { %1075 = vmatprep.subr.mxu0 %v594_v28  ;;  %1146 = vmatprep.subr.mxu1 %v596_v29  ;;  %v722_v28 = vld [vmem:[%s1916_s22 + $0xec8] sm:$0xff]  ;;  %v724_v29 = vld [vmem:[%s1916_s22 + $0xed8] sm:$0xff] }
 0x174   : > { %1076 = vmatpush1.xpose.msra.mxu0 %v593_v30  ;;  %1147 = vmatpush1.xpose.msra.mxu1 %v595_v31  ;;  %v721_v30 = vld [vmem:[%s1916_s22 + $0xec0] sm:$0xff]  ;;  %v723_v31 = vld [vmem:[%s1916_s22 + $0xed0] sm:$0xff] }
 0x175   : > { %1077 = vmatprep.subr.mxu0 %v586_v32  ;;  %1148 = vmatprep.subr.mxu1 %v588_v33  ;;  %v714_v32 = vld [vmem:[%s1916_s22 + $0xe88] sm:$0xff]  ;;  %v716_v33 = vld [vmem:[%s1916_s22 + $0xe98] sm:$0xff] }
 0x178   : > { %1078 = vmatpush1.xpose.msra.mxu0 %v585_v34  ;;  %1149 = vmatpush1.xpose.msra.mxu1 %v587_v35  ;;  %v713_v34 = vld [vmem:[%s1916_s22 + $0xe80] sm:$0xff]  ;;  %v715_v35 = vld [vmem:[%s1916_s22 + $0xe90] sm:$0xff] }
 0x179   : > { %1079 = vmatprep.subr.mxu0 %v578_v36  ;;  %1150 = vmatprep.subr.mxu1 %v580_v37  ;;  %v706_v36 = vld [vmem:[%s1916_s22 + $0xe48] sm:$0xff]  ;;  %v708_v37 = vld [vmem:[%s1916_s22 + $0xe58] sm:$0xff] }
 0x17c   : > { %1080 = vmatpush1.xpose.msra.mxu0 %v577_v38  ;;  %1151 = vmatpush1.xpose.msra.mxu1 %v579_v39  ;;  %v705_v38 = vld [vmem:[%s1916_s22 + $0xe40] sm:$0xff]  ;;  %v707_v39 = vld [vmem:[%s1916_s22 + $0xe50] sm:$0xff] }
 0x17d   : > { %1081 = vmatprep.subr.mxu0 %v570_v40  ;;  %1152 = vmatprep.subr.mxu1 %v572_v41  ;;  %v698_v40 = vld [vmem:[%s1916_s22 + $0xe08] sm:$0xff]  ;;  %v700_v41 = vld [vmem:[%s1916_s22 + $0xe18] sm:$0xff] }
 0x180   : > { %1082 = vmatpush1.xpose.msra.mxu0 %v569_v42  ;;  %1153 = vmatpush1.xpose.msra.mxu1 %v571_v43  ;;  %v697_v42 = vld [vmem:[%s1916_s22 + $0xe00] sm:$0xff]  ;;  %v699_v43 = vld [vmem:[%s1916_s22 + $0xe10] sm:$0xff] }
 0x181   : > { %1083 = vmatprep.subr.mxu0 %v562_v44  ;;  %1154 = vmatprep.subr.mxu1 %v564_v45  ;;  %v690_v44 = vld [vmem:[%s1916_s22 + $0xdc8] sm:$0xff]  ;;  %v692_v45 = vld [vmem:[%s1916_s22 + $0xdd8] sm:$0xff] }
 0x184   : > { %1084 = vmatpush1.xpose.msra.mxu0 %v561_v47  ;;  %1155 = vmatpush1.xpose.msra.mxu1 %v563_v48  ;;  %v689_v47 = vld [vmem:[%s1916_s22 + $0xdc0] sm:$0xff]  ;;  %v691_v48 = vld [vmem:[%s1916_s22 + $0xdd0] sm:$0xff] }
 0x185   : > { %1085 = vmatprep.subr.mxu0 %v554_v50  ;;  %1156 = vmatprep.subr.mxu1 %v556_v51  ;;  %v682_v50 = vld [vmem:[%s1916_s22 + $0xd88] sm:$0xff]  ;;  %v684_v51 = vld [vmem:[%s1916_s22 + $0xd98] sm:$0xff] }
 0x188   : > { %1086 = vmatpush1.xpose.msra.mxu0 %v553_v52  ;;  %1157 = vmatpush1.xpose.msra.mxu1 %v555_v53  ;;  %v681_v52 = vld [vmem:[%s1916_s22 + $0xd80] sm:$0xff]  ;;  %v683_v53 = vld [vmem:[%s1916_s22 + $0xd90] sm:$0xff] }
 0x189   : > { %1087 = vmatprep.subr.mxu0 %v546_v54  ;;  %1158 = vmatprep.subr.mxu1 %v548_v55  ;;  %v674_v54 = vld [vmem:[%s1916_s22 + $0xd48] sm:$0xff]  ;;  %v676_v55 = vld [vmem:[%s1916_s22 + $0xd58] sm:$0xff] }
 0x18c   : > { %1088 = vmatpush1.xpose.msra.mxu0 %v545_v56  ;;  %1159 = vmatpush1.xpose.msra.mxu1 %v547_v57  ;;  %v673_v56 = vld [vmem:[%s1916_s22 + $0xd40] sm:$0xff]  ;;  %v675_v57 = vld [vmem:[%s1916_s22 + $0xd50] sm:$0xff] }
 0x18d   : > { %1089 = vmatprep.subr.mxu0 %v538_v58  ;;  %1160 = vmatprep.subr.mxu1 %v540_v59  ;;  %v666_v58 = vld [vmem:[%s1916_s22 + $0xd08] sm:$0xff]  ;;  %v668_v59 = vld [vmem:[%s1916_s22 + $0xd18] sm:$0xff] }
 0x190   : > { %1090 = vmatpush1.xpose.msra.mxu0 %v537_v60  ;;  %1161 = vmatpush1.xpose.msra.mxu1 %v539_v61  ;;  %v665_v60 = vld [vmem:[%s1916_s22 + $0xd00] sm:$0xff]  ;;  %v667_v61 = vld [vmem:[%s1916_s22 + $0xd10] sm:$0xff] }
 0x191   : > { %1091 = vmatprep.subr.mxu0 %v530_v62  ;;  %1162 = vmatprep.subr.mxu1 %v532_v63  ;;  %v658_v62 = vld [vmem:[%s1916_s22 + $0xcc8] sm:$0xff]  ;;  %v660_v63 = vld [vmem:[%s1916_s22 + $0xcd8] sm:$0xff] }
 0x194   : > { %1092 = vmatpush1.xpose.msra.mxu0 %v529_v0  ;;  %1163 = vmatpush1.xpose.msra.mxu1 %v531_v1  ;;  %v657_v0 = vld [vmem:[%s1916_s22 + $0xcc0] sm:$0xff]  ;;  %v659_v1 = vld [vmem:[%s1916_s22 + $0xcd0] sm:$0xff] }
 0x195   : > { %1093 = vmatprep.subr.mxu0 %v522_v2  ;;  %1164 = vmatprep.subr.mxu1 %v524_v3  ;;  %v650_v2 = vld [vmem:[%s1916_s22 + $0xc88] sm:$0xff]  ;;  %v652_v3 = vld [vmem:[%s1916_s22 + $0xc98] sm:$0xff] }
 0x198   : > { %1094 = vmatpush1.xpose.msra.mxu0 %v521_v4  ;;  %1165 = vmatpush1.xpose.msra.mxu1 %v523_v5  ;;  %v649_v4 = vld [vmem:[%s1916_s22 + $0xc80] sm:$0xff]  ;;  %v651_v5 = vld [vmem:[%s1916_s22 + $0xc90] sm:$0xff] }
 0x199   : > { %1095 = vmatprep.subr.mxu0 %v514_v6  ;;  %1166 = vmatprep.subr.mxu1 %v516_v7  ;;  %v642_v6 = vld [vmem:[%s1916_s22 + $0xc48] sm:$0xff]  ;;  %v644_v7 = vld [vmem:[%s1916_s22 + $0xc58] sm:$0xff] }
 0x19c   : > { %1096 = vmatpush1.xpose.msra.mxu0 %v513_v8  ;;  %1167 = vmatpush1.xpose.msra.mxu1 %v515_v9  ;;  %v641_v8 = vld [vmem:[%s1916_s22 + $0xc40] sm:$0xff]  ;;  %v643_v9 = vld [vmem:[%s1916_s22 + $0xc50] sm:$0xff] }
 0x19d   : > { %1097 = vmatprep.subr.mxu0 %v506_v10  ;;  %1168 = vmatprep.subr.mxu1 %v508_v11  ;;  %v634_v10 = vld [vmem:[%s1916_s22 + $0xc08] sm:$0xff]  ;;  %v636_v11 = vld [vmem:[%s1916_s22 + $0xc18] sm:$0xff] }
 0x1a0   : > { %1098 = vmatpush1.xpose.msra.mxu0 %v505_v12  ;;  %1169 = vmatpush1.xpose.msra.mxu1 %v507_v13  ;;  %v633_v12 = vld [vmem:[%s1916_s22 + $0xc00] sm:$0xff]  ;;  %v635_v13 = vld [vmem:[%s1916_s22 + $0xc10] sm:$0xff] }
 0x1a1   : > { %1099 = vmatprep.subr.mxu0 %v754_v14  ;;  %1170 = vmatprep.subr.mxu1 %v756_v15  ;;  %v630_v14 = vld [vmem:[%s1916_s22 + $0xbe8] sm:$0xff]  ;;  %v632_v15 = vld [vmem:[%s1916_s22 + $0xbf8] sm:$0xff] }
 0x1a4   : > { %1100 = vmatpush2.xpose.msra.mxu0 %v753_v16  ;;  %1171 = vmatpush2.xpose.msra.mxu1 %v755_v17  ;;  %v629_v16 = vld [vmem:[%s1916_s22 + $0xbe0] sm:$0xff]  ;;  %v631_v17 = vld [vmem:[%s1916_s22 + $0xbf0] sm:$0xff] }
 0x1a5   : > { %1101 = vmatprep.subr.mxu0 %v746_v18  ;;  %1172 = vmatprep.subr.mxu1 %v748_v19  ;;  %v622_v18 = vld [vmem:[%s1916_s22 + $0xba8] sm:$0xff]  ;;  %v624_v19 = vld [vmem:[%s1916_s22 + $0xbb8] sm:$0xff] }
 0x1a8   : > { %1102 = vmatpush2.xpose.msra.mxu0 %v745_v20  ;;  %1173 = vmatpush2.xpose.msra.mxu1 %v747_v21  ;;  %v1561_v20 = vld [vmem:[#allocation2] sm:$0xff]  ;;  %v1562_v21 = vld [vmem:[#allocation2 + $0x10] sm:$0xff] }
 0x1a9   : > { %1103 = vmatprep.subr.mxu0 %v738_v22  ;;  %1174 = vmatprep.subr.mxu1 %v740_v23  ;;  %v621_v22 = vld [vmem:[%s1916_s22 + $0xba0] sm:$0xff]  ;;  %v623_v23 = vld [vmem:[%s1916_s22 + $0xbb0] sm:$0xff] }
 0x1ac   : > { %1104 = vmatpush2.xpose.msra.mxu0 %v737_v24  ;;  %1175 = vmatpush2.xpose.msra.mxu1 %v739_v25  ;;  %v614_v24 = vld [vmem:[%s1916_s22 + $0xb68] sm:$0xff]  ;;  %v616_v25 = vld [vmem:[%s1916_s22 + $0xb78] sm:$0xff] }
 0x1ad   : > { %1105 = vmatprep.subr.mxu0 %v730_v26  ;;  %1176 = vmatprep.subr.mxu1 %v732_v27  ;;  %v1563_v26 = vld [vmem:[#allocation2 + $0x28] sm:$0xff]  ;;  %v1564_v27 = vld [vmem:[#allocation2 + $0x38] sm:$0xff] }
 0x1b0   : > { %1106 = vmatpush2.xpose.msra.mxu0 %v729_v46  ;;  %1177 = vmatpush2.xpose.msra.mxu1 %v731_v49  ;;  %v613_v46 = vld [vmem:[%s1916_s22 + $0xb60] sm:$0xff]  ;;  %v615_v49 = vld [vmem:[%s1916_s22 + $0xb70] sm:$0xff] }
 0x1b1   : > { %1107 = vmatprep.subr.mxu0 %v722_v28  ;;  %1178 = vmatprep.subr.mxu1 %v724_v29  ;;  %v606_v28 = vld [vmem:[%s1916_s22 + $0xb28] sm:$0xff]  ;;  %v608_v29 = vld [vmem:[%s1916_s22 + $0xb38] sm:$0xff] }
 0x1b4   : > { %1108 = vmatpush2.xpose.msra.mxu0 %v721_v30  ;;  %1179 = vmatpush2.xpose.msra.mxu1 %v723_v31  ;;  %v605_v30 = vld [vmem:[%s1916_s22 + $0xb20] sm:$0xff]  ;;  %v607_v31 = vld [vmem:[%s1916_s22 + $0xb30] sm:$0xff] }
 0x1b5   : > { %1109 = vmatprep.subr.mxu0 %v714_v32  ;;  %1180 = vmatprep.subr.mxu1 %v716_v33  ;;  %v598_v32 = vld [vmem:[%s1916_s22 + $0xae8] sm:$0xff]  ;;  %v600_v33 = vld [vmem:[%s1916_s22 + $0xaf8] sm:$0xff] }
 0x1b8   : > { %1110 = vmatpush2.xpose.msra.mxu0 %v713_v34  ;;  %1181 = vmatpush2.xpose.msra.mxu1 %v715_v35  ;;  %v597_v34 = vld [vmem:[%s1916_s22 + $0xae0] sm:$0xff]  ;;  %v599_v35 = vld [vmem:[%s1916_s22 + $0xaf0] sm:$0xff] }
 0x1b9   : > { %1111 = vmatprep.subr.mxu0 %v706_v36  ;;  %1182 = vmatprep.subr.mxu1 %v708_v37  ;;  %v590_v36 = vld [vmem:[%s1916_s22 + $0xaa8] sm:$0xff]  ;;  %v592_v37 = vld [vmem:[%s1916_s22 + $0xab8] sm:$0xff] }
 0x1bc   : > { %1112 = vmatpush2.xpose.msra.mxu0 %v705_v38  ;;  %1183 = vmatpush2.xpose.msra.mxu1 %v707_v39  ;;  %v589_v38 = vld [vmem:[%s1916_s22 + $0xaa0] sm:$0xff]  ;;  %v591_v39 = vld [vmem:[%s1916_s22 + $0xab0] sm:$0xff] }
 0x1bd   : > { %1113 = vmatprep.subr.mxu0 %v698_v40  ;;  %1184 = vmatprep.subr.mxu1 %v700_v41  ;;  %v582_v40 = vld [vmem:[%s1916_s22 + $0xa68] sm:$0xff]  ;;  %v584_v41 = vld [vmem:[%s1916_s22 + $0xa78] sm:$0xff] }
 0x1c0   : > { %1114 = vmatpush2.xpose.msra.mxu0 %v697_v42  ;;  %1185 = vmatpush2.xpose.msra.mxu1 %v699_v43  ;;  %v581_v42 = vld [vmem:[%s1916_s22 + $0xa60] sm:$0xff]  ;;  %v583_v43 = vld [vmem:[%s1916_s22 + $0xa70] sm:$0xff] }
 0x1c1   : > { %1115 = vmatprep.subr.mxu0 %v690_v44  ;;  %1186 = vmatprep.subr.mxu1 %v692_v45  ;;  %v574_v44 = vld [vmem:[%s1916_s22 + $0xa28] sm:$0xff]  ;;  %v576_v45 = vld [vmem:[%s1916_s22 + $0xa38] sm:$0xff] }
 0x1c4   : > { %1116 = vmatpush2.xpose.msra.mxu0 %v689_v47  ;;  %1187 = vmatpush2.xpose.msra.mxu1 %v691_v48  ;;  %v573_v47 = vld [vmem:[%s1916_s22 + $0xa20] sm:$0xff]  ;;  %v575_v48 = vld [vmem:[%s1916_s22 + $0xa30] sm:$0xff] }
 0x1c5   : > { %1117 = vmatprep.subr.mxu0 %v682_v50  ;;  %1188 = vmatprep.subr.mxu1 %v684_v51  ;;  %v566_v50 = vld [vmem:[%s1916_s22 + $0x9e8] sm:$0xff]  ;;  %v568_v51 = vld [vmem:[%s1916_s22 + $0x9f8] sm:$0xff] }
 0x1c8   : > { %1118 = vmatpush2.xpose.msra.mxu0 %v681_v52  ;;  %1189 = vmatpush2.xpose.msra.mxu1 %v683_v53  ;;  %v565_v52 = vld [vmem:[%s1916_s22 + $0x9e0] sm:$0xff]  ;;  %v567_v53 = vld [vmem:[%s1916_s22 + $0x9f0] sm:$0xff] }
 0x1c9   : > { %1119 = vmatprep.subr.mxu0 %v674_v54  ;;  %1190 = vmatprep.subr.mxu1 %v676_v55  ;;  %v558_v54 = vld [vmem:[%s1916_s22 + $0x9a8] sm:$0xff]  ;;  %v560_v55 = vld [vmem:[%s1916_s22 + $0x9b8] sm:$0xff] }
 0x1cc   : > { %1120 = vmatpush2.xpose.msra.mxu0 %v673_v56  ;;  %1191 = vmatpush2.xpose.msra.mxu1 %v675_v57  ;;  %v557_v56 = vld [vmem:[%s1916_s22 + $0x9a0] sm:$0xff]  ;;  %v559_v57 = vld [vmem:[%s1916_s22 + $0x9b0] sm:$0xff] }
 0x1cd   : > { %1121 = vmatprep.subr.mxu0 %v666_v58  ;;  %1192 = vmatprep.subr.mxu1 %v668_v59  ;;  %v550_v58 = vld [vmem:[%s1916_s22 + $0x968] sm:$0xff]  ;;  %v552_v59 = vld [vmem:[%s1916_s22 + $0x978] sm:$0xff] }
 0x1d0   : > { %1122 = vmatpush2.xpose.msra.mxu0 %v665_v60  ;;  %1193 = vmatpush2.xpose.msra.mxu1 %v667_v61  ;;  %v549_v60 = vld [vmem:[%s1916_s22 + $0x960] sm:$0xff]  ;;  %v551_v61 = vld [vmem:[%s1916_s22 + $0x970] sm:$0xff] }
 0x1d1   : > { %1123 = vmatprep.subr.mxu0 %v658_v62  ;;  %1194 = vmatprep.subr.mxu1 %v660_v63  ;;  %v542_v62 = vld [vmem:[%s1916_s22 + $0x928] sm:$0xff]  ;;  %v544_v63 = vld [vmem:[%s1916_s22 + $0x938] sm:$0xff] }
 0x1d4   : > { %1124 = vmatpush2.xpose.msra.mxu0 %v657_v0  ;;  %1195 = vmatpush2.xpose.msra.mxu1 %v659_v1  ;;  %v541_v0 = vld [vmem:[%s1916_s22 + $0x920] sm:$0xff]  ;;  %v543_v1 = vld [vmem:[%s1916_s22 + $0x930] sm:$0xff] }
 0x1d5   : > { %1125 = vmatprep.subr.mxu0 %v650_v2  ;;  %1196 = vmatprep.subr.mxu1 %v652_v3  ;;  %v763_v2 = vlaneseq  ;;  %v534_v3 = vld [vmem:[%s1916_s22 + $0x8e8] sm:$0xff] }
 0x1d8   : > { %1126 = vmatpush2.xpose.msra.mxu0 %v649_v4  ;;  %1197 = vmatpush2.xpose.msra.mxu1 %v651_v5  ;;  %v536_v4 = vld [vmem:[%s1916_s22 + $0x8f8] sm:$0xff]  ;;  %v533_v5 = vld [vmem:[%s1916_s22 + $0x8e0] sm:$0xff] }
 0x1d9   : > { %1127 = vmatprep.subr.mxu0 %v642_v6  ;;  %1198 = vmatprep.subr.mxu1 %v644_v7  ;;  %v535_v6 = vld [vmem:[%s1916_s22 + $0x8f0] sm:$0xff]  ;;  %v2367_v7 = vshrl.u32 %v763_v2, 7  ;;  %v712_v2 = vld [vmem:[%s1916_s22 + $0xe78] sm:$0xff] }
 0x1dc   : > { %1128 = vmatpush2.xpose.msra.mxu0 %v641_v8  ;;  %1199 = vmatpush2.xpose.msra.mxu1 %v643_v9  ;;  %v526_v8 = vld [vmem:[%s1916_s22 + $0x8a8] sm:$0xff]  ;;  %v528_v9 = vld [vmem:[%s1916_s22 + $0x8b8] sm:$0xff] }
 0x1dd   : > { %1129 = vmatprep.subr.mxu0 %v634_v10  ;;  %1200 = vmatprep.subr.mxu1 %v636_v11  ;;  %v525_v10 = vld [vmem:[%s1916_s22 + $0x8a0] sm:$0xff]  ;;  %v527_v11 = vld [vmem:[%s1916_s22 + $0x8b0] sm:$0xff] }
 0x1e0   : > { %1130 = vmatpush2.xpose.msra.mxu0 %v633_v12  ;;  %1201 = vmatpush2.xpose.msra.mxu1 %v635_v13  ;;  %v765_v12 = vsub.s32 0, %v2367_v7  ;;  %v518_v13 = vld [vmem:[%s1916_s22 + $0x868] sm:$0xff] }
 0x1e1   : > { %1209 = vmatprep.subr.mxu0 %v630_v14  ;;  %1280 = vmatprep.subr.mxu1 %v632_v15  ;;  %v520_v14 = vld [vmem:[%s1916_s22 + $0x878] sm:$0xff]  ;;  %v2376_v15 = vld [vmem:[%s210_s4] sm:$0xf] }
 0x1e3   : > { %1132 = vmatmul.mubr.f32.vlgmr.msra.gmra.mxu0 %v1561_v20  ;;  %1203 = vmatmul.mubr.f32.vlgmr.msra.gmra.mxu1 %v1562_v21  ;;  %v766_v20 = vrot.slane %v2376_v15, %v765_v12  ;;  %v510_v21 = vld [vmem:[%s1916_s22 + $0x828] sm:$0xff]  ;;  %v693_v12 = vld [vmem:[%s1916_s22 + $0xde0] sm:$0xff] }
 0x1e4   : > { %1210 = vmatpush1.xpose.msra.mxu0 %v629_v16  ;;  %1281 = vmatpush1.xpose.msra.mxu1 %v631_v17  ;;  %v769_v16 = vsub.s32 1, %v2367_v7  ;;  %v849_v17 = vpop.f32.mrf.mxu0 }
 0x1e5   : > { %1211 = vmatprep.subr.mxu0 %v622_v18  ;;  %1282 = vmatprep.subr.mxu1 %v624_v19  ;;  %v517_v18 = vld [vmem:[%s1916_s22 + $0x860] sm:$0xff]  ;;  %v519_v19 = vld [vmem:[%s1916_s22 + $0x870] sm:$0xff] }
 0x1e6   : > { %1273 = vmatprep.mubr.f32.mxu0 %v1563_v26  ;;  %1344 = vmatprep.mubr.f32.mxu1 %v1564_v27  ;;  %v509_v26 = vld [vmem:[%s1916_s22 + $0x820] sm:$0xff]  ;;  %v511_v27 = vld [vmem:[%s1916_s22 + $0x830] sm:$0xff] }
 0x1e8   : > { %1212 = vmatpush1.xpose.msra.mxu0 %v621_v22  ;;  %1283 = vmatpush1.xpose.msra.mxu1 %v623_v23  ;;  %v512_v22 = vld [vmem:[%s1916_s22 + $0x838] sm:$0xff]  ;;  %v770_v23 = vrot.slane %v2376_v15, %v769_v16 }
 0x1e9   : > { %1213 = vmatprep.subr.mxu0 %v614_v24  ;;  %1284 = vmatprep.subr.mxu1 %v616_v25  ;;  %v920_v24 = vpop.f32.mrf.mxu1  ;;  %v851_v25 = vpop.f32.mrf.mxu0  ;;  %v688_v16 = vld [vmem:[%s1916_s22 + $0xdb8] sm:$0xff] }
 0x1ec   : > { %1214 = vmatpush1.xpose.msra.mxu0 %v613_v46  ;;  %1285 = vmatpush1.xpose.msra.mxu1 %v615_v49  ;;  %v850_v46 = vadd.f32 %v849_v17, %v766_v20  ;;  %v758_v49 = vld [vmem:[%s1916_s22 + $0xfe8] sm:$0xff]  ;;  %v685_v17 = vld [vmem:[%s1916_s22 + $0xda0] sm:$0xff]  ;;  %v680_v20 = vld [vmem:[%s1916_s22 + $0xd78] sm:$0xff] }
 0x1ed   : > { %1215 = vmatprep.subr.mxu0 %v606_v28  ;;  %1286 = vmatprep.subr.mxu1 %v608_v29  ;;  %v760_v28 = vld [vmem:[%s1916_s22 + $0xff8] sm:$0xff]  ;;  %v852_v29 = vadd.f32 %v851_v25, %v770_v23  ;;  %v670_v23 = vld [vmem:[%s1916_s22 + $0xd28] sm:$0xff]  ;;  %v669_v25 = vld [vmem:[%s1916_s22 + $0xd20] sm:$0xff] }
 0x1f0   : > { %1216 = vmatpush1.xpose.msra.mxu0 %v605_v30  ;;  %1287 = vmatpush1.xpose.msra.mxu1 %v607_v31  ;;  %v922_v30 = vpop.f32.mrf.mxu1  ;;  %v757_v31 = vld [vmem:[%s1916_s22 + $0xfe0] sm:$0xff] }
 0x1f1   : > { %1217 = vmatprep.subr.mxu0 %v598_v32  ;;  %1288 = vmatprep.subr.mxu1 %v600_v33  ;;  %v759_v32 = vld [vmem:[%s1916_s22 + $0xff0] sm:$0xff]  ;;  %v921_v33 = vadd.f32 %v920_v24, %v850_v46  ;;  %v672_v24 = vld [vmem:[%s1916_s22 + $0xd38] sm:$0xff] }
 0x1f2   : > { %v664_v46 = vld [vmem:[%s1916_s22 + $0xcf8] sm:$0xff] }
 0x1f4   : > { %1218 = vmatpush1.xpose.msra.mxu0 %v597_v34  ;;  %1289 = vmatpush1.xpose.msra.mxu1 %v599_v35  ;;  %v750_v34 = vld [vmem:[%s1916_s22 + $0xfa8] sm:$0xff]  ;;  %v752_v35 = vld [vmem:[%s1916_s22 + $0xfb8] sm:$0xff] }
 0x1f5   : > { %1219 = vmatprep.subr.mxu0 %v590_v36  ;;  %1290 = vmatprep.subr.mxu1 %v592_v37 }
 0x1f8   : > { %1220 = vmatpush1.xpose.msra.mxu0 %v589_v38  ;;  %1291 = vmatpush1.xpose.msra.mxu1 %v591_v39  ;;  %v923_v38 = vadd.f32 %v922_v30, %v852_v29  ;;  %v654_v29 = vld [vmem:[%s1916_s22 + $0xca8] sm:$0xff]  ;;  %v656_v30 = vld [vmem:[%s1916_s22 + $0xcb8] sm:$0xff] }
 0x1f9   : > { %1221 = vmatprep.subr.mxu0 %v582_v40  ;;  %1292 = vmatprep.subr.mxu1 %v584_v41 }
 0x1fc   : > { %1222 = vmatpush1.xpose.msra.mxu0 %v581_v42  ;;  %1293 = vmatpush1.xpose.msra.mxu1 %v583_v43  ;;  %v749_v42 = vld [vmem:[%s1916_s22 + $0xfa0] sm:$0xff]  ;;  %v751_v43 = vld [vmem:[%s1916_s22 + $0xfb0] sm:$0xff] }
 0x1fd   : > { %1223 = vmatprep.subr.mxu0 %v574_v44  ;;  %1294 = vmatprep.subr.mxu1 %v576_v45 }
 0x200   : > { %1224 = vmatpush1.xpose.msra.mxu0 %v573_v47  ;;  %1295 = vmatpush1.xpose.msra.mxu1 %v575_v48  ;;  %v742_v47 = vld [vmem:[%s1916_s22 + $0xf68] sm:$0xff]  ;;  %v744_v48 = vld [vmem:[%s1916_s22 + $0xf78] sm:$0xff] }
 0x201   : > { %1225 = vmatprep.subr.mxu0 %v566_v50  ;;  %1296 = vmatprep.subr.mxu1 %v568_v51  ;;  %v741_v51 = vld [vmem:[%s1916_s22 + $0xf60] sm:$0xff] }
 0x204   : > { %1226 = vmatpush1.xpose.msra.mxu0 %v565_v52  ;;  %1297 = vmatpush1.xpose.msra.mxu1 %v567_v53  ;;  %v743_v52 = vld [vmem:[%s1916_s22 + $0xf70] sm:$0xff]  ;;  %v734_v53 = vld [vmem:[%s1916_s22 + $0xf28] sm:$0xff] }
 0x205   : > { %1227 = vmatprep.subr.mxu0 %v558_v54  ;;  %1298 = vmatprep.subr.mxu1 %v560_v55  ;;  %v736_v54 = vld [vmem:[%s1916_s22 + $0xf38] sm:$0xff]  ;;  %v733_v55 = vld [vmem:[%s1916_s22 + $0xf20] sm:$0xff] }
 0x208   : > { %1228 = vmatpush1.xpose.msra.mxu0 %v557_v56  ;;  %1299 = vmatpush1.xpose.msra.mxu1 %v559_v57  ;;  %v735_v56 = vld [vmem:[%s1916_s22 + $0xf30] sm:$0xff]  ;;  %v726_v57 = vld [vmem:[%s1916_s22 + $0xee8] sm:$0xff] }
 0x209   : > { %1229 = vmatprep.subr.mxu0 %v550_v58  ;;  %1300 = vmatprep.subr.mxu1 %v552_v59  ;;  %v728_v58 = vld [vmem:[%s1916_s22 + $0xef8] sm:$0xff]  ;;  %v725_v59 = vld [vmem:[%s1916_s22 + $0xee0] sm:$0xff] }
 0x20c   : > { %1230 = vmatpush1.xpose.msra.mxu0 %v549_v60  ;;  %1301 = vmatpush1.xpose.msra.mxu1 %v551_v61  ;;  %v727_v60 = vld [vmem:[%s1916_s22 + $0xef0] sm:$0xff]  ;;  %v718_v61 = vld [vmem:[%s1916_s22 + $0xea8] sm:$0xff] }
 0x20d   : > { %1231 = vmatprep.subr.mxu0 %v542_v62  ;;  %1302 = vmatprep.subr.mxu1 %v544_v63  ;;  %v720_v62 = vld [vmem:[%s1916_s22 + $0xeb8] sm:$0xff]  ;;  %v717_v63 = vld [vmem:[%s1916_s22 + $0xea0] sm:$0xff] }
 0x210   : > { %1232 = vmatpush1.xpose.msra.mxu0 %v541_v0  ;;  %1303 = vmatpush1.xpose.msra.mxu1 %v543_v1  ;;  %v719_v0 = vld [vmem:[%s1916_s22 + $0xeb0] sm:$0xff]  ;;  %v710_v1 = vld [vmem:[%s1916_s22 + $0xe68] sm:$0xff] }
 0x211   : > { %1233 = vmatprep.subr.mxu0 %v534_v3  ;;  %1304 = vmatprep.subr.mxu1 %v536_v4  ;;  %v709_v3 = vld [vmem:[%s1916_s22 + $0xe60] sm:$0xff]  ;;  %v711_v4 = vld [vmem:[%s1916_s22 + $0xe70] sm:$0xff] }
 0x214   : > { %1234 = vmatpush1.xpose.msra.mxu0 %v533_v5  ;;  %1305 = vmatpush1.xpose.msra.mxu1 %v535_v6  ;;  %v702_v5 = vld [vmem:[%s1916_s22 + $0xe28] sm:$0xff]  ;;  %v704_v6 = vld [vmem:[%s1916_s22 + $0xe38] sm:$0xff] }
 0x215   : > { %1235 = vmatprep.subr.mxu0 %v526_v8  ;;  %1306 = vmatprep.subr.mxu1 %v528_v9  ;;  %v701_v8 = vld [vmem:[%s1916_s22 + $0xe20] sm:$0xff]  ;;  %v703_v9 = vld [vmem:[%s1916_s22 + $0xe30] sm:$0xff] }
 0x218   : > { %1236 = vmatpush1.xpose.msra.mxu0 %v525_v10  ;;  %1307 = vmatpush1.xpose.msra.mxu1 %v527_v11  ;;  %v694_v10 = vld [vmem:[%s1916_s22 + $0xde8] sm:$0xff]  ;;  %v696_v11 = vld [vmem:[%s1916_s22 + $0xdf8] sm:$0xff] }
 0x219   : > { %1237 = vmatprep.subr.mxu0 %v518_v13  ;;  %1308 = vmatprep.subr.mxu1 %v520_v14  ;;  %v695_v13 = vld [vmem:[%s1916_s22 + $0xdf0] sm:$0xff]  ;;  %v686_v14 = vld [vmem:[%s1916_s22 + $0xda8] sm:$0xff] }
 0x21c   : > { %1238 = vmatpush1.xpose.msra.mxu0 %v517_v18  ;;  %1309 = vmatpush1.xpose.msra.mxu1 %v519_v19  ;;  %v687_v18 = vld [vmem:[%s1916_s22 + $0xdb0] sm:$0xff]  ;;  %v678_v19 = vld [vmem:[%s1916_s22 + $0xd68] sm:$0xff] }
 0x21d   : > { %1239 = vmatprep.subr.mxu0 %v510_v21  ;;  %1310 = vmatprep.subr.mxu1 %v512_v22  ;;  %v677_v21 = vld [vmem:[%s1916_s22 + $0xd60] sm:$0xff]  ;;  %v679_v22 = vld [vmem:[%s1916_s22 + $0xd70] sm:$0xff] }
 0x220   : > { %1240 = vmatpush1.xpose.msra.mxu0 %v509_v26  ;;  %1311 = vmatpush1.xpose.msra.mxu1 %v511_v27  ;;  %v671_v26 = vld [vmem:[%s1916_s22 + $0xd30] sm:$0xff]  ;;  %v662_v27 = vld [vmem:[%s1916_s22 + $0xce8] sm:$0xff] }
 0x221   : > { %1241 = vmatprep.subr.mxu0 %v758_v49  ;;  %1312 = vmatprep.subr.mxu1 %v760_v28  ;;  %v661_v49 = vld [vmem:[%s1916_s22 + $0xce0] sm:$0xff]  ;;  %v663_v28 = vld [vmem:[%s1916_s22 + $0xcf0] sm:$0xff] }
 0x223   : > { %v991_v36 = vpop.f32.mrf.mxu0  ;;  %v1062_v37 = vpop.f32.mrf.mxu1 }
 0x224   : > { %v992_v39 = vadd.f32 %v991_v36, %v921_v33  ;;  %1242 = vmatpush2.xpose.msra.mxu0 %v757_v31  ;;  %1313 = vmatpush2.xpose.msra.mxu1 %v759_v32  ;;  %v653_v31 = vld [vmem:[%s1916_s22 + $0xca0] sm:$0xff]  ;;  %v655_v32 = vld [vmem:[%s1916_s22 + $0xcb0] sm:$0xff]  ;;  %v646_v33 = vld [vmem:[%s1916_s22 + $0xc68] sm:$0xff] }
 0x225   : > { %v993_v40 = vpop.f32.mrf.mxu0  ;;  %v1064_v41 = vpop.f32.mrf.mxu1  ;;  %1243 = vmatprep.subr.mxu0 %v750_v34  ;;  %1314 = vmatprep.subr.mxu1 %v752_v35  ;;  %v648_v34 = vld [vmem:[%s1916_s22 + $0xc78] sm:$0xff]  ;;  %v645_v35 = vld [vmem:[%s1916_s22 + $0xc60] sm:$0xff]  ;;  %v647_v36 = vld [vmem:[%s1916_s22 + $0xc70] sm:$0xff] }
 0x226   : > { %v1063_v44 = vadd.f32 %v1062_v37, %v992_v39  ;;  %v994_v45 = vadd.f32 %v993_v40, %v923_v38  ;;  %v638_v37 = vld [vmem:[%s1916_s22 + $0xc28] sm:$0xff]  ;;  %v640_v38 = vld [vmem:[%s1916_s22 + $0xc38] sm:$0xff]  ;;  %v637_v39 = vld [vmem:[%s1916_s22 + $0xc20] sm:$0xff] }
 0x227   : > { %v639_v40 = vld [vmem:[%s1916_s22 + $0xc30] sm:$0xff] }
 0x228   : > { %1351 = vst [vmem:[%s2398_s24] sm:$0xff] %v1063_v44  ;;  %v1065_v50 = vadd.f32 %v1064_v41, %v994_v45  ;;  %1244 = vmatpush2.xpose.msra.mxu0 %v749_v42  ;;  %1315 = vmatpush2.xpose.msra.mxu1 %v751_v43  ;;  %v1565_v41 = vld [vmem:[#allocation2 + $0x20] sm:$0xff]  ;;  %v1566_v42 = vld [vmem:[#allocation2 + $0x30] sm:$0xff]  ;;  %v773_v43 = vsub.s32 2, %v2367_v7  ;;  %v777_v44 = vsub.s32 3, %v2367_v7 }
 0x229   : > { %1245 = vmatprep.subr.mxu0 %v742_v47  ;;  %1316 = vmatprep.subr.mxu1 %v744_v48 }
 0x22a   : > { %1352 = vst [vmem:[%s2398_s24 + $0x8] sm:$0xff] %v1065_v50  ;;  %v774_v47 = vrot.slane %v2376_v15, %v773_v43  ;;  %v778_v48 = vrot.slane %v2376_v15, %v777_v44 }
 0x22c   : > { %1246 = vmatpush2.xpose.msra.mxu0 %v741_v51  ;;  %1317 = vmatpush2.xpose.msra.mxu1 %v743_v52 }
 0x22d   : > { %1247 = vmatprep.subr.mxu0 %v734_v53  ;;  %1318 = vmatprep.subr.mxu1 %v736_v54 }
 0x230   : > { %1248 = vmatpush2.xpose.msra.mxu0 %v733_v55  ;;  %1319 = vmatpush2.xpose.msra.mxu1 %v735_v56 }
 0x231   : > { %1249 = vmatprep.subr.mxu0 %v726_v57  ;;  %1320 = vmatprep.subr.mxu1 %v728_v58 }
 0x234   : > { %1250 = vmatpush2.xpose.msra.mxu0 %v725_v59  ;;  %1321 = vmatpush2.xpose.msra.mxu1 %v727_v60 }
 0x235   : > { %1251 = vmatprep.subr.mxu0 %v718_v61  ;;  %1322 = vmatprep.subr.mxu1 %v720_v62 }
 0x238   : > { %1252 = vmatpush2.xpose.msra.mxu0 %v717_v63  ;;  %1323 = vmatpush2.xpose.msra.mxu1 %v719_v0 }
 0x239   : > { %1253 = vmatprep.subr.mxu0 %v710_v1  ;;  %1324 = vmatprep.subr.mxu1 %v712_v2 }
 0x23c   : > { %1254 = vmatpush2.xpose.msra.mxu0 %v709_v3  ;;  %1325 = vmatpush2.xpose.msra.mxu1 %v711_v4 }
 0x23d   : > { %1255 = vmatprep.subr.mxu0 %v702_v5  ;;  %1326 = vmatprep.subr.mxu1 %v704_v6 }
 0x240   : > { %1256 = vmatpush2.xpose.msra.mxu0 %v701_v8  ;;  %1327 = vmatpush2.xpose.msra.mxu1 %v703_v9 }
 0x241   : > { %1257 = vmatprep.subr.mxu0 %v694_v10  ;;  %1328 = vmatprep.subr.mxu1 %v696_v11 }
 0x244   : > { %1258 = vmatpush2.xpose.msra.mxu0 %v693_v12  ;;  %1329 = vmatpush2.xpose.msra.mxu1 %v695_v13 }
 0x245   : > { %1259 = vmatprep.subr.mxu0 %v686_v14  ;;  %1330 = vmatprep.subr.mxu1 %v688_v16 }
 0x248   : > { %1260 = vmatpush2.xpose.msra.mxu0 %v685_v17  ;;  %1331 = vmatpush2.xpose.msra.mxu1 %v687_v18 }
 0x249   : > { %1261 = vmatprep.subr.mxu0 %v678_v19  ;;  %1332 = vmatprep.subr.mxu1 %v680_v20 }
 0x24c   : > { %1262 = vmatpush2.xpose.msra.mxu0 %v677_v21  ;;  %1333 = vmatpush2.xpose.msra.mxu1 %v679_v22 }
 0x24d   : > { %1263 = vmatprep.subr.mxu0 %v670_v23  ;;  %1334 = vmatprep.subr.mxu1 %v672_v24 }
 0x250   : > { %1264 = vmatpush2.xpose.msra.mxu0 %v669_v25  ;;  %1335 = vmatpush2.xpose.msra.mxu1 %v671_v26 }
 0x251   : > { %1265 = vmatprep.subr.mxu0 %v662_v27  ;;  %1336 = vmatprep.subr.mxu1 %v664_v46 }
 0x254   : > { %1266 = vmatpush2.xpose.msra.mxu0 %v661_v49  ;;  %1337 = vmatpush2.xpose.msra.mxu1 %v663_v28 }
 0x255   : > { %1267 = vmatprep.subr.mxu0 %v654_v29  ;;  %1338 = vmatprep.subr.mxu1 %v656_v30 }
 0x258   : > { %1268 = vmatpush2.xpose.msra.mxu0 %v653_v31  ;;  %1339 = vmatpush2.xpose.msra.mxu1 %v655_v32 }
 0x259   : > { %1269 = vmatprep.subr.mxu0 %v646_v33  ;;  %1340 = vmatprep.subr.mxu1 %v648_v34 }
 0x25c   : > { %1270 = vmatpush2.xpose.msra.mxu0 %v645_v35  ;;  %1341 = vmatpush2.xpose.msra.mxu1 %v647_v36 }
 0x25d   : > { %1271 = vmatprep.subr.mxu0 %v638_v37  ;;  %1342 = vmatprep.subr.mxu1 %v640_v38 }
 0x260   : > { %1272 = vmatpush2.xpose.msra.mxu0 %v637_v39  ;;  %1343 = vmatpush2.xpose.msra.mxu1 %v639_v40 }
 0x263   : > { %1274 = vmatmul.mubr.f32.vlgmr.msra.gmra.mxu0 %v1565_v41  ;;  %1345 = vmatmul.mubr.f32.vlgmr.msra.gmra.mxu1 %v1566_v42 }
 0x2a3   : > { %v1133_v45 = vpop.f32.mrf.mxu0  ;;  %v1204_v50 = vpop.f32.mrf.mxu1 }
 0x2a4   : > { %v1134_v52 = vadd.f32 %v1133_v45, %v774_v47 }
 0x2a5   : > { %v1135_v51 = vpop.f32.mrf.mxu0  ;;  %v1206_v54 = vpop.f32.mrf.mxu1 }
 0x2a6   : > { %v1136_v53 = vadd.f32 %v1135_v51, %v778_v48  ;;  %v1205_v55 = vadd.f32 %v1204_v50, %v1134_v52 }
 0x2a8   : > { %v1207_v58 = vadd.f32 %v1206_v54, %v1136_v53 }
 0x323   : > { %v1275_v56 = vpop.f32.mrf.mxu0  ;;  %v1346_v57 = vpop.f32.mrf.mxu1 }
 0x324   : > { %v1276_v7 = vadd.f32 %v1275_v56, %v1205_v55 }
 0x325   : > { %v1277_v59 = vpop.f32.mrf.mxu0  ;;  %v1348_v15 = vpop.f32.mrf.mxu1 }
 0x326   : > { %v1347_v60 = vadd.f32 %v1346_v57, %v1276_v7  ;;  %v1278_v61 = vadd.f32 %v1277_v59, %v1207_v58 }
 0x328   : > { %1353 = vst [vmem:[%s2398_s24 + $0x10] sm:$0xff] %v1347_v60  ;;  %v1349_v62 = vadd.f32 %v1348_v15, %v1278_v61 }
 0x32a   : > { %1354 = vst [vmem:[%s2398_s24 + $0x18] sm:$0xff] %v1349_v62 }
 0x32b   : > { %1662 = shalt.err (!%p1659_p1)
}
 0x32c   : > { %s1663_s30 = scalar_lea.hbm %s1368_s9, 512  ;;  %s1667_s17 = scalar_lea.hbm %s2501_s3, 1024 }
 0x32d   : > { %p1664_p9 = scmp.ne.s32.totalorder %s1368_s9, %s1663_s30  ;;  %p1668_p7 = scmp.lt.s32.totalorder %s1368_s9, %s2501_s3 }
 0x32e   : > { %p1669_p0 = scmp.lt.s32.totalorder %s1667_s17, %s1663_s30 }
 0x32f   : > { %p1665_p11 = pnand %p1664_p9, %p2518_p8 }
 0x330   : > { %p1670_p3 = por %p1669_p0, %p1668_p7 }
 0x331   : > { %p1666_p6 = pneg %p1665_p11 }
 0x333   : > { %p1671_p12 = pnand %p1670_p3, %p1666_p6 }
 0x335   : > { %1674 = shalt.err (!%p1671_p12)
}
 0x336   : > { %1505 = dma.vmem_to_hbm [thread:$0]  (%p2518_p8), %s1371_s7, 512, %s1368_s9, %s1356_s21  }
 0x337 PF: > { %s1382_s4 = sand.u32 1, %s1705_s12   ;;  %p2519_p10 = scmp.ne.s32.totalorder %s2510_s27, 0 }
 0x338   : > { %p2520_p4 = scmp.ge.s32.totalorder %s1717_s15, 2  ;;  %s1383_s6 = scalar_lea.sflag [#allocation4], %s1382_s4 }
 0x33a   : > { %p1519_p5 = pnand %p2520_p4, %p2519_p10 }
 0x33c   : > { %p1520_p13 = pneg %p1519_p5 }
 0x33e   : > { %1700 = dma.done.wait (%p1520_p13), %s1383_s6, 512  }
 0x33f   : > { %1702 = vsyncadd (%p1520_p13), %s1383_s6, 4294966784  ;;  %p17_p2 = scmp.ge.s32.totalorder %s1766_s16, 4   ;;  %s2521_s12 = smov %s1709_s13 }
 0x340   : > { %s2522_s13 = smov %s1713_s14  ;;  %s2523_s14 = smov %s1777_s19 }
 0x341   : > { %s2524_s15 = smov %s1766_s16  ;;  %19 = sbr.rel (!%p17_p2) target bundleno = 6 (0x6), region = 93 }
 0x346   :  { %1388 = vsyncpa [#allocation3], 1 }
 0x347   :  { %1390 = vsyncpa [#allocation3 + $0x1], 1 }
 0x348   :  { %1391 = vsyncpa [#allocation6], 1 }
 0x349   :  { %1393 = vsyncpa [#allocation6 + $0x1], 1 }
 0x34a   :  { %1394 = vsyncpa [#allocation4], 1 }
 0x34b   :  { %1396 = vsyncpa [#allocation4 + $0x1], 1 }

</bundles_post_ra>
